<compile_context>
chip_gen: v7x
topology: tpu7x:2x2x1
jax: 0.10.0
libtpu: 0.0.40
codegen_flags: <defaults>
</compile_context>

<pallas_src>
import math

import jax
import jax.numpy as jnp
from jax.experimental import pallas as pl
from jax.experimental.pallas import tpu as pltpu

# ---- tiny deterministic "bert-base"-style config (scaled down) ----
HIDDEN = 32
NUM_LAYERS = 2
NUM_HEADS = 4
HEAD_DIM = HIDDEN // NUM_HEADS
INTERMEDIATE = 64
VOCAB = 100
MAX_POS = 64
TYPE_VOCAB = 2
NUM_CLASSES = 3
LN_EPS = 1e-12
LANE = 128       # lane-dense padded classifier width
SUBLANE = 8      # sublane padding of the logits output tile


# --------------------------- in-kernel math helpers ---------------------------

def _layernorm(x, g, b):
    mean = jnp.mean(x, axis=-1, keepdims=True)
    cen = x - mean
    var = jnp.mean(cen * cen, axis=-1, keepdims=True)
    return cen * jax.lax.rsqrt(var + LN_EPS) * g + b


def _gelu_tanh(x):
    # tanh approximation of GELU; PyTorch nn.GELU defaults to exact erf (<1e-3 diff).
    # TODO(synk): exact erf-based GELU if bit-level parity with PyTorch is required.
    c = math.sqrt(2.0 / math.pi)
    return 0.5 * x * (1.0 + jnp.tanh(c * (x + 0.044715 * x * x * x)))


# --------------------------- fused Pallas kernel ---------------------------

def _bert_fused_kernel(emb_ref, mask_ref, embg_ref, embb_ref,
                       wqkv_ref, bqkv_ref, wo_ref, bo_ref, ln1g_ref, ln1b_ref,
                       wi_ref, bi_ref, wf_ref, bf_ref, ln2g_ref, ln2b_ref,
                       wp_ref, bp_ref, wc_ref, bc_ref,
                       logits_ref,
                       hid_ref):
    """Grid = (batch, layer). One encoder layer per step; hidden state carried in VMEM."""
    lyr = pl.program_id(1)

    # ---- embedding LayerNorm (first layer step only) ----
    @pl.when(lyr == 0)
    def _():
        hid_ref[...] = _layernorm(emb_ref[...], embg_ref[...], embb_ref[...])

    x = hid_ref[...]                                             # [S, H] f32

    # ---- fused QKV projection: one MXU matmul, bf16 in / f32 accumulate ----
    qkv = jnp.dot(x.astype(jnp.bfloat16), wqkv_ref[0],
                  preferred_element_type=jnp.float32) + bqkv_ref[0]   # [S, 3H]
    scale = 1.0 / math.sqrt(HEAD_DIM)
    q = qkv[:, :HIDDEN] * scale
    k = qkv[:, HIDDEN:2 * HIDDEN]
    v = qkv[:, 2 * HIDDEN:]

    # ---- head-batched attention (single dot_general per matmul) ----
    qh = jnp.stack([q[:, h * HEAD_DIM:(h + 1) * HEAD_DIM]
                    for h in range(NUM_HEADS)]).astype(jnp.bfloat16)   # [nh, S, Dh]
    kh = jnp.stack([k[:, h * HEAD_DIM:(h + 1) * HEAD_DIM]
                    for h in range(NUM_HEADS)]).astype(jnp.bfloat16)
    vh = jnp.stack([v[:, h * HEAD_DIM:(h + 1) * HEAD_DIM]
                    for h in range(NUM_HEADS)]).astype(jnp.bfloat16)

    mask_b = mask_ref[0]                                         # [1, S] additive key mask
    scores = jnp.einsum('hqd,hkd->hqk', qh, kh,
                        preferred_element_type=jnp.float32) + mask_b   # [nh, S, S]
    m = jnp.max(scores, axis=-1, keepdims=True)
    p = jnp.exp(scores - m)
    denom = jnp.sum(p, axis=-1, keepdims=True)
    p = p * pl.reciprocal(denom, approx=True)                    # EUP reciprocal
    ctxh = jnp.einsum('hqk,hkd->hqd', p.astype(jnp.bfloat16), vh,
                      preferred_element_type=jnp.float32)        # [nh, S, Dh]
    # combine heads along lanes, entirely in vregs (no VMEM scratch)
    ctx = jnp.concatenate([ctxh[h] for h in range(NUM_HEADS)], axis=-1)   # [S, H]

    # ---- output projection + residual + LN1 ----
    attn = jnp.dot(ctx.astype(jnp.bfloat16), wo_ref[0],
                   preferred_element_type=jnp.float32) + bo_ref[0]
    h1 = _layernorm(attn + x, ln1g_ref[0], ln1b_ref[0])

    # ---- FFN(GELU) + residual + LN2 ----
    ffn_in = jnp.dot(h1.astype(jnp.bfloat16), wi_ref[0],
                     preferred_element_type=jnp.float32) + bi_ref[0]
    ffn_in = _gelu_tanh(ffn_in)
    ffn = jnp.dot(ffn_in.astype(jnp.bfloat16), wf_ref[0],
                  preferred_element_type=jnp.float32) + bf_ref[0]
    h2 = _layernorm(ffn + h1, ln2g_ref[0], ln2b_ref[0])
    hid_ref[...] = h2                                            # carry to next layer step

    # ---- pooler + dropout(identity at eval) + classifier (last layer step only) ----
    @pl.when(lyr == pl.num_programs(1) - 1)
    def _():
        cls = h2[0:1, :]                                         # [CLS] token, [1, H]
        pooled = jnp.tanh(
            jnp.dot(cls.astype(jnp.bfloat16), wp_ref[...],
                    preferred_element_type=jnp.float32) + bp_ref[...])
        row = (jnp.dot(pooled.astype(jnp.bfloat16), wc_ref[...],
                       preferred_element_type=jnp.float32) + bc_ref[...])   # [1, LANE]
        logits_ref[...] = jnp.broadcast_to(row, (1, SUBLANE, LANE))


def bert_fused_forward(emb2d, mask_add, p, *, batch, seq):
    h, inter, nl = HIDDEN, INTERMEDIATE, NUM_LAYERS

    def per_layer(shape):   # stacked [L, ...] weights, selected by layer grid index
        return pl.BlockSpec((1,) + shape, lambda b, l, _s=len(shape): (l,) + (0,) * _s)

    def shared(shape):      # same block every grid step
        return pl.BlockSpec(shape, lambda b, l, _s=len(shape): (0,) * _s)

    return pl.pallas_call(
        _bert_fused_kernel,
        out_shape=jax.ShapeDtypeStruct((batch, SUBLANE, LANE), jnp.float32),
        grid=(batch, nl),
        in_specs=[
            pl.BlockSpec((seq, h), lambda b, l: (b, 0)),         # embeddings [B*S, H]
            pl.BlockSpec((1, 1, seq), lambda b, l: (b, 0, 0)),   # additive key mask [B,1,S]
            shared((1, h)), shared((1, h)),                      # embedding LN
            per_layer((h, 3 * h)), per_layer((1, 3 * h)),        # fused QKV
            per_layer((h, h)), per_layer((1, h)),                # attn output proj
            per_layer((1, h)), per_layer((1, h)),                # LN1
            per_layer((h, inter)), per_layer((1, inter)),        # FFN in
            per_layer((inter, h)), per_layer((1, h)),            # FFN out
            per_layer((1, h)), per_layer((1, h)),                # LN2
            shared((h, h)), shared((1, h)),                      # pooler
            shared((h, LANE)), shared((1, LANE)),                # classifier (lane-padded)
        ],
        out_specs=pl.BlockSpec((1, SUBLANE, LANE), lambda b, l: (b, 0, 0)),
        scratch_shapes=[pltpu.VMEM((seq, h), jnp.float32)],      # hidden-state carry
        compiler_params=pltpu.CompilerParams(
            dimension_semantics=("parallel", "arbitrary")),      # batch across cores, layers serial
    )(emb2d, mask_add, p["emb_ln_g"], p["emb_ln_b"],
      p["qkv_w"], p["qkv_b"], p["o_w"], p["o_b"], p["ln1_g"], p["ln1_b"],
      p["i_w"], p["i_b"], p["f_w"], p["f_b"], p["ln2_g"], p["ln2_b"],
      p["pool_w"], p["pool_b"], p["fc_w"], p["fc_b"])


# --------------------------- params & model glue ---------------------------

def init_params(key):
    keys = iter(jax.random.split(key, 16))
    L, H, I = NUM_LAYERS, HIDDEN, INTERMEDIATE

    def w_bf16(shape):
        return (jax.random.normal(next(keys), shape, jnp.float32) * 0.02).astype(jnp.bfloat16)

    def zeros(shape):
        return jnp.zeros(shape, jnp.float32)

    def ones(shape):
        return jnp.ones(shape, jnp.float32)

    fc_core = jax.random.normal(next(keys), (H, NUM_CLASSES), jnp.float32) * 0.02
    fc_w_pad = jnp.zeros((H, LANE), jnp.float32).at[:, :NUM_CLASSES].set(fc_core)

    return {
        "word_emb": jax.random.normal(next(keys), (VOCAB, H), jnp.float32) * 0.02,
        "pos_emb": jax.random.normal(next(keys), (MAX_POS, H), jnp.float32) * 0.02,
        "type_emb": jax.random.normal(next(keys), (TYPE_VOCAB, H), jnp.float32) * 0.02,
        "emb_ln_g": ones((1, H)), "emb_ln_b": zeros((1, H)),
        # per-layer weights stacked on a leading [L, ...] axis
        "qkv_w": w_bf16((L, H, 3 * H)), "qkv_b": zeros((L, 1, 3 * H)),
        "o_w": w_bf16((L, H, H)), "o_b": zeros((L, 1, H)),
        "ln1_g": ones((L, 1, H)), "ln1_b": zeros((L, 1, H)),
        "i_w": w_bf16((L, H, I)), "i_b": zeros((L, 1, I)),
        "f_w": w_bf16((L, I, H)), "f_b": zeros((L, 1, H)),
        "ln2_g": ones((L, 1, H)), "ln2_b": zeros((L, 1, H)),
        "pool_w": w_bf16((H, H)), "pool_b": zeros((1, H)),
        "fc_w": fc_w_pad.astype(jnp.bfloat16), "fc_b": zeros((1, LANE)),
    }


@jax.jit
def bert_classifier_forward(params, input_ids, attention_mask):
    bsz, seq = input_ids.shape
    # embedding gathers + adds stay in plain JAX (XLA fuses them)
    we = params["word_emb"][input_ids]                 # [B,S,H]
    pe = params["pos_emb"][:seq]                       # [S,H]
    te = params["type_emb"][0]                         # [H]   (token_type_ids == 0)
    emb2d = (we + pe[None, :, :] + te[None, None, :]).reshape(bsz * seq, HIDDEN)
    # additive key mask: [B,S] -> [B,1,S] with -10000 on padded keys
    mask_add = ((1.0 - attention_mask.astype(jnp.float32)) * -10000.0
                ).reshape(bsz, 1, seq)
    out_pad = bert_fused_forward(emb2d, mask_add, params, batch=bsz, seq=seq)
    return out_pad[:, 0, :NUM_CLASSES]                 # strip lane/sublane padding


# --------------------------- pure-JAX f32 reference ---------------------------

def _reference_forward(params, input_ids, attention_mask):
    bsz, seq = input_ids.shape
    f32 = jnp.float32

    def ln(x, g, b):
        mean = x.mean(-1, keepdims=True)
        c = x - mean
        var = (c * c).mean(-1, keepdims=True)
        return c * jax.lax.rsqrt(var + LN_EPS) * g + b

    we = params["word_emb"][input_ids]
    pe = params["pos_emb"][:seq]
    te = params["type_emb"][0]
    h = ln(we + pe[None] + te[None, None], params["emb_ln_g"], params["emb_ln_b"])
    mask = (1.0 - attention_mask.astype(f32)) * -10000.0           # [B,S]

    for li in range(NUM_LAYERS):
        qkv = h @ params["qkv_w"][li].astype(f32) + params["qkv_b"][li]
        q = qkv[..., :HIDDEN] / math.sqrt(HEAD_DIM)
        k = qkv[..., HIDDEN:2 * HIDDEN]
        v = qkv[..., 2 * HIDDEN:]

        def split(t):
            return t.reshape(bsz, seq, NUM_HEADS, HEAD_DIM).transpose(0, 2, 1, 3)

        qh, kh, vh = split(q), split(k), split(v)                  # [B,nh,S,Dh]
        scores = qh @ kh.transpose(0, 1, 3, 2) + mask[:, None, None, :]
        p = jax.nn.softmax(scores, axis=-1)
        ctx = (p @ vh).transpose(0, 2, 1, 3).reshape(bsz, seq, HIDDEN)
        attn = ctx @ params["o_w"][li].astype(f32) + params["o_b"][li]
        h1 = ln(attn + h, params["ln1_g"][li], params["ln1_b"][li])
        ff = _gelu_tanh(h1 @ params["i_w"][li].astype(f32) + params["i_b"][li])
        ff = ff @ params["f_w"][li].astype(f32) + params["f_b"][li]
        h = ln(ff + h1, params["ln2_g"][li], params["ln2_b"][li])

    cls = h[:, 0, :]
    pooled = jnp.tanh(cls @ params["pool_w"].astype(f32) + params["pool_b"])
    logits = pooled @ params["fc_w"].astype(f32) + params["fc_b"]
    return logits[:, :NUM_CLASSES]


if __name__ == "__main__":
    key = jax.random.PRNGKey(0)
    pkey, ikey = jax.random.split(key)
    params = init_params(pkey)

    batch, seq = 2, 8
    input_ids = jax.random.randint(ikey, (batch, seq), 0, VOCAB, dtype=jnp.int32)
    attention_mask = jnp.array([[1] * seq, [1] * (seq - 2) + [0] * 2], dtype=jnp.int32)

    logits = bert_classifier_forward(params, input_ids, attention_mask)
    logits = jax.block_until_ready(logits)

    assert logits.shape == (batch, NUM_CLASSES)
    assert bool(jnp.all(jnp.isfinite(logits)))

    ref = _reference_forward(params, input_ids, attention_mask)
    assert bool(jnp.allclose(logits, ref, atol=2e-2)), (logits, ref)

    print("KERNEL_OK")
</pallas_src>

<mosaic_0001>
module attributes {stable_mosaic.version = 11 : i64} {
  func.func @_bert_fused_kernel(%arg0: i32, %arg1: i32, %arg2: memref<8x32xf32, #tpu.memory_space<vmem>>, %arg3: memref<1x1x8xf32, #tpu.memory_space<vmem>>, %arg4: memref<1x32xf32, #tpu.memory_space<vmem>>, %arg5: memref<1x32xf32, #tpu.memory_space<vmem>>, %arg6: memref<1x32x96xbf16, #tpu.memory_space<vmem>>, %arg7: memref<1x1x96xf32, #tpu.memory_space<vmem>>, %arg8: memref<1x32x32xbf16, #tpu.memory_space<vmem>>, %arg9: memref<1x1x32xf32, #tpu.memory_space<vmem>>, %arg10: memref<1x1x32xf32, #tpu.memory_space<vmem>>, %arg11: memref<1x1x32xf32, #tpu.memory_space<vmem>>, %arg12: memref<1x32x64xbf16, #tpu.memory_space<vmem>>, %arg13: memref<1x1x64xf32, #tpu.memory_space<vmem>>, %arg14: memref<1x64x32xbf16, #tpu.memory_space<vmem>>, %arg15: memref<1x1x32xf32, #tpu.memory_space<vmem>>, %arg16: memref<1x1x32xf32, #tpu.memory_space<vmem>>, %arg17: memref<1x1x32xf32, #tpu.memory_space<vmem>>, %arg18: memref<32x32xbf16, #tpu.memory_space<vmem>>, %arg19: memref<1x32xf32, #tpu.memory_space<vmem>>, %arg20: memref<32x128xbf16, #tpu.memory_space<vmem>>, %arg21: memref<1x128xf32, #tpu.memory_space<vmem>>, %arg22: memref<1x8x128xf32, #tpu.memory_space<vmem>>, %arg23: memref<8x32xf32, #tpu.memory_space<vmem>>) attributes {dimension_semantics = [#tpu.dimension_semantics<parallel>, #tpu.dimension_semantics<arbitrary>], iteration_bounds = array<i64: 2, 2>, scalar_prefetch = 0 : i64, scratch_operands = 1 : i64, tpu.core_type = #tpu.core_type<tc>, window_params = [{transform_indices = @transform_0, window_bounds = array<i64: 8, 32>}, {transform_indices = @transform_1, window_bounds = array<i64: 1, 1, 8>}, {pipeline_mode = #tpu.pipeline_mode<synchronous>, transform_indices = @transform_2, window_bounds = array<i64: 1, 32>}, {pipeline_mode = #tpu.pipeline_mode<synchronous>, transform_indices = @transform_3, window_bounds = array<i64: 1, 32>}, {transform_indices = @transform_4, window_bounds = array<i64: 1, 32, 96>}, {transform_indices = @transform_5, window_bounds = array<i64: 1, 1, 96>}, {transform_indices = @transform_6, window_bounds = array<i64: 1, 32, 32>}, {transform_indices = @transform_7, window_bounds = array<i64: 1, 1, 32>}, {transform_indices = @transform_8, window_bounds = array<i64: 1, 1, 32>}, {transform_indices = @transform_9, window_bounds = array<i64: 1, 1, 32>}, {transform_indices = @transform_10, window_bounds = array<i64: 1, 32, 64>}, {transform_indices = @transform_11, window_bounds = array<i64: 1, 1, 64>}, {transform_indices = @transform_12, window_bounds = array<i64: 1, 64, 32>}, {transform_indices = @transform_13, window_bounds = array<i64: 1, 1, 32>}, {transform_indices = @transform_14, window_bounds = array<i64: 1, 1, 32>}, {transform_indices = @transform_15, window_bounds = array<i64: 1, 1, 32>}, {pipeline_mode = #tpu.pipeline_mode<synchronous>, transform_indices = @transform_16, window_bounds = array<i64: 32, 32>}, {pipeline_mode = #tpu.pipeline_mode<synchronous>, transform_indices = @transform_17, window_bounds = array<i64: 1, 32>}, {pipeline_mode = #tpu.pipeline_mode<synchronous>, transform_indices = @transform_18, window_bounds = array<i64: 32, 128>}, {pipeline_mode = #tpu.pipeline_mode<synchronous>, transform_indices = @transform_19, window_bounds = array<i64: 1, 128>}, {transform_indices = @transform_20, window_bounds = array<i64: 1, 8, 128>}]} {
    %c0_i32 = arith.constant 0 : i32
    %0 = arith.cmpi eq, %arg1, %c0_i32 : i32
    %1 = arith.extui %0 : i1 to i32
    %c0_i32_0 = arith.constant 0 : i32
    %2 = arith.cmpi ne, %1, %c0_i32_0 : i32
    scf.if %2 {
      %c0_66 = arith.constant 0 : index
      %c0_67 = arith.constant 0 : index
      %165 = vector.load %arg2[%c0_66, %c0_67] : memref<8x32xf32, #tpu.memory_space<vmem>>, vector<8x32xf32>
      %c0_68 = arith.constant 0 : index
      %c0_69 = arith.constant 0 : index
      %166 = vector.load %arg4[%c0_68, %c0_69] : memref<1x32xf32, #tpu.memory_space<vmem>>, vector<1x32xf32>
      %c0_70 = arith.constant 0 : index
      %c0_71 = arith.constant 0 : index
      %167 = vector.load %arg5[%c0_70, %c0_71] : memref<1x32xf32, #tpu.memory_space<vmem>>, vector<1x32xf32>
      %cst_72 = arith.constant dense<0.000000e+00> : vector<8xf32>
      %168 = vector.multi_reduction <add>, %165, %cst_72 [1] : vector<8x32xf32> to vector<8xf32>
      %169 = vector.shape_cast %168 : vector<8xf32> to vector<8x1xf32>
      %cst_73 = arith.constant 3.200000e+01 : f32
      %170 = vector.broadcast %cst_73 : f32 to vector<8x1xf32>
      %171 = arith.divf %169, %170 : vector<8x1xf32>
      %172 = vector.broadcast %171 : vector<8x1xf32> to vector<8x32xf32>
      %173 = arith.subf %165, %172 : vector<8x32xf32>
      %174 = arith.mulf %173, %173 : vector<8x32xf32>
      %cst_74 = arith.constant dense<0.000000e+00> : vector<8xf32>
      %175 = vector.multi_reduction <add>, %174, %cst_74 [1] : vector<8x32xf32> to vector<8xf32>
      %176 = vector.shape_cast %175 : vector<8xf32> to vector<8x1xf32>
      %cst_75 = arith.constant 3.200000e+01 : f32
      %177 = vector.broadcast %cst_75 : f32 to vector<8x1xf32>
      %178 = arith.divf %176, %177 : vector<8x1xf32>
      %cst_76 = arith.constant 9.99999996E-13 : f32
      %179 = vector.broadcast %cst_76 : f32 to vector<8x1xf32>
      %180 = arith.addf %178, %179 : vector<8x1xf32>
      %181 = math.rsqrt %180 : vector<8x1xf32>
      %182 = vector.broadcast %181 : vector<8x1xf32> to vector<8x32xf32>
      %183 = arith.mulf %173, %182 : vector<8x32xf32>
      %184 = vector.broadcast %166 : vector<1x32xf32> to vector<8x32xf32>
      %185 = arith.mulf %183, %184 : vector<8x32xf32>
      %186 = vector.broadcast %167 : vector<1x32xf32> to vector<8x32xf32>
      %187 = arith.addf %185, %186 : vector<8x32xf32>
      %c0_77 = arith.constant 0 : index
      %c0_78 = arith.constant 0 : index
      %188 = vector.load %arg23[%c0_77, %c0_78] : memref<8x32xf32, #tpu.memory_space<vmem>>, vector<8x32xf32>
      tpu.vector_store %arg23[%c0_77, %c0_78], %187 {strides = array<i32>} : memref<8x32xf32, #tpu.memory_space<vmem>>, vector<8x32xf32>,
    } else {
    }
    %c0 = arith.constant 0 : index
    %c0_1 = arith.constant 0 : index
    %3 = vector.load %arg23[%c0, %c0_1] : memref<8x32xf32, #tpu.memory_space<vmem>>, vector<8x32xf32>
    %4 = arith.truncf %3 : vector<8x32xf32> to vector<8x32xbf16>
    %c0_2 = arith.constant 0 : index
    %c0_3 = arith.constant 0 : index
    %c0_4 = arith.constant 0 : index
    %5 = vector.load %arg6[%c0_2, %c0_3, %c0_4] : memref<1x32x96xbf16, #tpu.memory_space<vmem>>, vector<1x32x96xbf16>
    %6 = vector.shape_cast %5 : vector<1x32x96xbf16> to vector<32x96xbf16>
    %cst = arith.constant dense<0.000000e+00> : vector<8x96xf32>
    %7 = tpu.matmul %4, %6, %cst {dimension_numbers = #tpu.dot_dimension_numbers<[1], [0], [0], [1], [0, 0, 1, 1], [], []>} : vector<8x32xbf16>, vector<32x96xbf16>, vector<8x96xf32> -> vector<8x96xf32>
    %c0_5 = arith.constant 0 : index
    %c0_6 = arith.constant 0 : index
    %c0_7 = arith.constant 0 : index
    %8 = vector.load %arg7[%c0_5, %c0_6, %c0_7] : memref<1x1x96xf32, #tpu.memory_space<vmem>>, vector<1x1x96xf32>
    %9 = vector.shape_cast %8 : vector<1x1x96xf32> to vector<1x96xf32>
    %10 = vector.broadcast %9 : vector<1x96xf32> to vector<8x96xf32>
    %11 = arith.addf %7, %10 : vector<8x96xf32>
    %12 = vector.extract_strided_slice %11 {offsets = [0, 0], sizes = [8, 32], strides = [1, 1]} : vector<8x96xf32> to vector<8x32xf32>
    %cst_8 = arith.constant 0.353553385 : f32
    %13 = vector.broadcast %cst_8 : f32 to vector<8x32xf32>
    %14 = arith.mulf %12, %13 : vector<8x32xf32>
    %15 = vector.extract_strided_slice %11 {offsets = [0, 32], sizes = [8, 32], strides = [1, 1]} : vector<8x96xf32> to vector<8x32xf32>
    %16 = vector.extract_strided_slice %11 {offsets = [0, 64], sizes = [8, 32], strides = [1, 1]} : vector<8x96xf32> to vector<8x32xf32>
    %17 = vector.extract_strided_slice %14 {offsets = [0, 0], sizes = [8, 8], strides = [1, 1]} : vector<8x32xf32> to vector<8x8xf32>
    %18 = vector.extract_strided_slice %14 {offsets = [0, 8], sizes = [8, 8], strides = [1, 1]} : vector<8x32xf32> to vector<8x8xf32>
    %19 = vector.extract_strided_slice %14 {offsets = [0, 16], sizes = [8, 8], strides = [1, 1]} : vector<8x32xf32> to vector<8x8xf32>
    %20 = vector.extract_strided_slice %14 {offsets = [0, 24], sizes = [8, 8], strides = [1, 1]} : vector<8x32xf32> to vector<8x8xf32>
    %21 = vector.shape_cast %17 : vector<8x8xf32> to vector<1x8x8xf32>
    %22 = vector.shape_cast %18 : vector<8x8xf32> to vector<1x8x8xf32>
    %23 = vector.shape_cast %19 : vector<8x8xf32> to vector<1x8x8xf32>
    %24 = vector.shape_cast %20 : vector<8x8xf32> to vector<1x8x8xf32>
    %25 = tpu.concatenate %21, %22, %23, %24 in 0 : vector<1x8x8xf32>, vector<1x8x8xf32>, vector<1x8x8xf32>, vector<1x8x8xf32> -> vector<4x8x8xf32>
    %26 = arith.truncf %25 : vector<4x8x8xf32> to vector<4x8x8xbf16>
    %27 = vector.extract_strided_slice %15 {offsets = [0, 0], sizes = [8, 8], strides = [1, 1]} : vector<8x32xf32> to vector<8x8xf32>
    %28 = vector.extract_strided_slice %15 {offsets = [0, 8], sizes = [8, 8], strides = [1, 1]} : vector<8x32xf32> to vector<8x8xf32>
    %29 = vector.extract_strided_slice %15 {offsets = [0, 16], sizes = [8, 8], strides = [1, 1]} : vector<8x32xf32> to vector<8x8xf32>
    %30 = vector.extract_strided_slice %15 {offsets = [0, 24], sizes = [8, 8], strides = [1, 1]} : vector<8x32xf32> to vector<8x8xf32>
    %31 = vector.shape_cast %27 : vector<8x8xf32> to vector<1x8x8xf32>
    %32 = vector.shape_cast %28 : vector<8x8xf32> to vector<1x8x8xf32>
    %33 = vector.shape_cast %29 : vector<8x8xf32> to vector<1x8x8xf32>
    %34 = vector.shape_cast %30 : vector<8x8xf32> to vector<1x8x8xf32>
    %35 = tpu.concatenate %31, %32, %33, %34 in 0 : vector<1x8x8xf32>, vector<1x8x8xf32>, vector<1x8x8xf32>, vector<1x8x8xf32> -> vector<4x8x8xf32>
    %36 = arith.truncf %35 : vector<4x8x8xf32> to vector<4x8x8xbf16>
    %37 = vector.extract_strided_slice %16 {offsets = [0, 0], sizes = [8, 8], strides = [1, 1]} : vector<8x32xf32> to vector<8x8xf32>
    %38 = vector.extract_strided_slice %16 {offsets = [0, 8], sizes = [8, 8], strides = [1, 1]} : vector<8x32xf32> to vector<8x8xf32>
    %39 = vector.extract_strided_slice %16 {offsets = [0, 16], sizes = [8, 8], strides = [1, 1]} : vector<8x32xf32> to vector<8x8xf32>
    %40 = vector.extract_strided_slice %16 {offsets = [0, 24], sizes = [8, 8], strides = [1, 1]} : vector<8x32xf32> to vector<8x8xf32>
    %41 = vector.shape_cast %37 : vector<8x8xf32> to vector<1x8x8xf32>
    %42 = vector.shape_cast %38 : vector<8x8xf32> to vector<1x8x8xf32>
    %43 = vector.shape_cast %39 : vector<8x8xf32> to vector<1x8x8xf32>
    %44 = vector.shape_cast %40 : vector<8x8xf32> to vector<1x8x8xf32>
    %45 = tpu.concatenate %41, %42, %43, %44 in 0 : vector<1x8x8xf32>, vector<1x8x8xf32>, vector<1x8x8xf32>, vector<1x8x8xf32> -> vector<4x8x8xf32>
    %46 = arith.truncf %45 : vector<4x8x8xf32> to vector<4x8x8xbf16>
    %c0_9 = arith.constant 0 : index
    %c0_10 = arith.constant 0 : index
    %c0_11 = arith.constant 0 : index
    %47 = vector.load %arg3[%c0_9, %c0_10, %c0_11] : memref<1x1x8xf32, #tpu.memory_space<vmem>>, vector<1x1x8xf32>
    %48 = vector.shape_cast %47 : vector<1x1x8xf32> to vector<1x8xf32>
    "tpu.trace_start"() <{level = 10 : i32, message = "hqd,hkd->hqk"}> : () -> ()
    %cst_12 = arith.constant dense<0.000000e+00> : vector<4x8x8xf32>
    %49 = tpu.matmul %26, %36, %cst_12 {dimension_numbers = #tpu.dot_dimension_numbers<[2], [2], [1], [1], [0, 0, 0, 1, 1, 1], [0], [0]>} : vector<4x8x8xbf16>, vector<4x8x8xbf16>, vector<4x8x8xf32> -> vector<4x8x8xf32>
    "tpu.trace_stop"() : () -> ()
    %50 = vector.shape_cast %48 : vector<1x8xf32> to vector<1x1x8xf32>
    %51 = vector.broadcast %50 : vector<1x1x8xf32> to vector<4x8x8xf32>
    %52 = arith.addf %49, %51 : vector<4x8x8xf32>
    %cst_13 = arith.constant dense<0xFF800000> : vector<4x8xf32>
    %53 = vector.multi_reduction <maximumf>, %52, %cst_13 [2] : vector<4x8x8xf32> to vector<4x8xf32>
    %54 = vector.shape_cast %53 : vector<4x8xf32> to vector<4x8x1xf32>
    %55 = vector.broadcast %54 : vector<4x8x1xf32> to vector<4x8x8xf32>
    %56 = arith.subf %52, %55 : vector<4x8x8xf32>
    %57 = math.exp %56 : vector<4x8x8xf32>
    %cst_14 = arith.constant dense<0.000000e+00> : vector<4x8xf32>
    %58 = vector.multi_reduction <add>, %57, %cst_14 [2] : vector<4x8x8xf32> to vector<4x8xf32>
    %59 = vector.shape_cast %58 : vector<4x8xf32> to vector<4x8x1xf32>
    %60 = tpu.reciprocal %59 {approx = true} : vector<4x8x1xf32> -> vector<4x8x1xf32>
    %61 = vector.broadcast %60 : vector<4x8x1xf32> to vector<4x8x8xf32>
    %62 = arith.mulf %57, %61 : vector<4x8x8xf32>
    %63 = arith.truncf %62 : vector<4x8x8xf32> to vector<4x8x8xbf16>
    "tpu.trace_start"() <{level = 10 : i32, message = "hqk,hkd->hqd"}> : () -> ()
    %cst_15 = arith.constant dense<0.000000e+00> : vector<4x8x8xf32>
    %64 = tpu.matmul %63, %46, %cst_15 {dimension_numbers = #tpu.dot_dimension_numbers<[2], [1], [1], [2], [0, 0, 0, 1, 1, 2], [0], [0]>} : vector<4x8x8xbf16>, vector<4x8x8xbf16>, vector<4x8x8xf32> -> vector<4x8x8xf32>
    "tpu.trace_stop"() : () -> ()
    %65 = vector.extract_strided_slice %64 {offsets = [0, 0, 0], sizes = [1, 8, 8], strides = [1, 1, 1]} : vector<4x8x8xf32> to vector<1x8x8xf32>
    %66 = vector.shape_cast %65 : vector<1x8x8xf32> to vector<8x8xf32>
    %67 = vector.extract_strided_slice %64 {offsets = [1, 0, 0], sizes = [1, 8, 8], strides = [1, 1, 1]} : vector<4x8x8xf32> to vector<1x8x8xf32>
    %68 = vector.shape_cast %67 : vector<1x8x8xf32> to vector<8x8xf32>
    %69 = vector.extract_strided_slice %64 {offsets = [2, 0, 0], sizes = [1, 8, 8], strides = [1, 1, 1]} : vector<4x8x8xf32> to vector<1x8x8xf32>
    %70 = vector.shape_cast %69 : vector<1x8x8xf32> to vector<8x8xf32>
    %71 = vector.extract_strided_slice %64 {offsets = [3, 0, 0], sizes = [1, 8, 8], strides = [1, 1, 1]} : vector<4x8x8xf32> to vector<1x8x8xf32>
    %72 = vector.shape_cast %71 : vector<1x8x8xf32> to vector<8x8xf32>
    %73 = tpu.concatenate %66, %68, %70, %72 in 1 : vector<8x8xf32>, vector<8x8xf32>, vector<8x8xf32>, vector<8x8xf32> -> vector<8x32xf32>
    %74 = arith.truncf %73 : vector<8x32xf32> to vector<8x32xbf16>
    %c0_16 = arith.constant 0 : index
    %c0_17 = arith.constant 0 : index
    %c0_18 = arith.constant 0 : index
    %75 = vector.load %arg8[%c0_16, %c0_17, %c0_18] : memref<1x32x32xbf16, #tpu.memory_space<vmem>>, vector<1x32x32xbf16>
    %76 = vector.shape_cast %75 : vector<1x32x32xbf16> to vector<32x32xbf16>
    %cst_19 = arith.constant dense<0.000000e+00> : vector<8x32xf32>
    %77 = tpu.matmul %74, %76, %cst_19 {dimension_numbers = #tpu.dot_dimension_numbers<[1], [0], [0], [1], [0, 0, 1, 1], [], []>} : vector<8x32xbf16>, vector<32x32xbf16>, vector<8x32xf32> -> vector<8x32xf32>
    %c0_20 = arith.constant 0 : index
    %c0_21 = arith.constant 0 : index
    %c0_22 = arith.constant 0 : index
    %78 = vector.load %arg9[%c0_20, %c0_21, %c0_22] : memref<1x1x32xf32, #tpu.memory_space<vmem>>, vector<1x1x32xf32>
    %79 = vector.shape_cast %78 : vector<1x1x32xf32> to vector<1x32xf32>
    %80 = vector.broadcast %79 : vector<1x32xf32> to vector<8x32xf32>
    %81 = arith.addf %77, %80 : vector<8x32xf32>
    %82 = arith.addf %81, %3 : vector<8x32xf32>
    %c0_23 = arith.constant 0 : index
    %c0_24 = arith.constant 0 : index
    %c0_25 = arith.constant 0 : index
    %83 = vector.load %arg10[%c0_23, %c0_24, %c0_25] : memref<1x1x32xf32, #tpu.memory_space<vmem>>, vector<1x1x32xf32>
    %84 = vector.shape_cast %83 : vector<1x1x32xf32> to vector<1x32xf32>
    %c0_26 = arith.constant 0 : index
    %c0_27 = arith.constant 0 : index
    %c0_28 = arith.constant 0 : index
    %85 = vector.load %arg11[%c0_26, %c0_27, %c0_28] : memref<1x1x32xf32, #tpu.memory_space<vmem>>, vector<1x1x32xf32>
    %86 = vector.shape_cast %85 : vector<1x1x32xf32> to vector<1x32xf32>
    %cst_29 = arith.constant dense<0.000000e+00> : vector<8xf32>
    %87 = vector.multi_reduction <add>, %82, %cst_29 [1] : vector<8x32xf32> to vector<8xf32>
    %88 = vector.shape_cast %87 : vector<8xf32> to vector<8x1xf32>
    %cst_30 = arith.constant 3.200000e+01 : f32
    %89 = vector.broadcast %cst_30 : f32 to vector<8x1xf32>
    %90 = arith.divf %88, %89 : vector<8x1xf32>
    %91 = vector.broadcast %90 : vector<8x1xf32> to vector<8x32xf32>
    %92 = arith.subf %82, %91 : vector<8x32xf32>
    %93 = arith.mulf %92, %92 : vector<8x32xf32>
    %cst_31 = arith.constant dense<0.000000e+00> : vector<8xf32>
    %94 = vector.multi_reduction <add>, %93, %cst_31 [1] : vector<8x32xf32> to vector<8xf32>
    %95 = vector.shape_cast %94 : vector<8xf32> to vector<8x1xf32>
    %cst_32 = arith.constant 3.200000e+01 : f32
    %96 = vector.broadcast %cst_32 : f32 to vector<8x1xf32>
    %97 = arith.divf %95, %96 : vector<8x1xf32>
    %cst_33 = arith.constant 9.99999996E-13 : f32
    %98 = vector.broadcast %cst_33 : f32 to vector<8x1xf32>
    %99 = arith.addf %97, %98 : vector<8x1xf32>
    %100 = math.rsqrt %99 : vector<8x1xf32>
    %101 = vector.broadcast %100 : vector<8x1xf32> to vector<8x32xf32>
    %102 = arith.mulf %92, %101 : vector<8x32xf32>
    %103 = vector.broadcast %84 : vector<1x32xf32> to vector<8x32xf32>
    %104 = arith.mulf %102, %103 : vector<8x32xf32>
    %105 = vector.broadcast %86 : vector<1x32xf32> to vector<8x32xf32>
    %106 = arith.addf %104, %105 : vector<8x32xf32>
    %107 = arith.truncf %106 : vector<8x32xf32> to vector<8x32xbf16>
    %c0_34 = arith.constant 0 : index
    %c0_35 = arith.constant 0 : index
    %c0_36 = arith.constant 0 : index
    %108 = vector.load %arg12[%c0_34, %c0_35, %c0_36] : memref<1x32x64xbf16, #tpu.memory_space<vmem>>, vector<1x32x64xbf16>
    %109 = vector.shape_cast %108 : vector<1x32x64xbf16> to vector<32x64xbf16>
    %cst_37 = arith.constant dense<0.000000e+00> : vector<8x64xf32>
    %110 = tpu.matmul %107, %109, %cst_37 {dimension_numbers = #tpu.dot_dimension_numbers<[1], [0], [0], [1], [0, 0, 1, 1], [], []>} : vector<8x32xbf16>, vector<32x64xbf16>, vector<8x64xf32> -> vector<8x64xf32>
    %c0_38 = arith.constant 0 : index
    %c0_39 = arith.constant 0 : index
    %c0_40 = arith.constant 0 : index
    %111 = vector.load %arg13[%c0_38, %c0_39, %c0_40] : memref<1x1x64xf32, #tpu.memory_space<vmem>>, vector<1x1x64xf32>
    %112 = vector.shape_cast %111 : vector<1x1x64xf32> to vector<1x64xf32>
    %113 = vector.broadcast %112 : vector<1x64xf32> to vector<8x64xf32>
    %114 = arith.addf %110, %113 : vector<8x64xf32>
    %cst_41 = arith.constant 5.000000e-01 : f32
    %115 = vector.broadcast %cst_41 : f32 to vector<8x64xf32>
    %116 = arith.mulf %115, %114 : vector<8x64xf32>
    %cst_42 = arith.constant 4.471500e-02 : f32
    %117 = vector.broadcast %cst_42 : f32 to vector<8x64xf32>
    %118 = arith.mulf %117, %114 : vector<8x64xf32>
    %119 = arith.mulf %118, %114 : vector<8x64xf32>
    %120 = arith.mulf %119, %114 : vector<8x64xf32>
    %121 = arith.addf %114, %120 : vector<8x64xf32>
    %cst_43 = arith.constant 0.797884583 : f32
    %122 = vector.broadcast %cst_43 : f32 to vector<8x64xf32>
    %123 = arith.mulf %122, %121 : vector<8x64xf32>
    %124 = math.tanh %123 : vector<8x64xf32>
    %cst_44 = arith.constant 1.000000e+00 : f32
    %125 = vector.broadcast %cst_44 : f32 to vector<8x64xf32>
    %126 = arith.addf %125, %124 : vector<8x64xf32>
    %127 = arith.mulf %116, %126 : vector<8x64xf32>
    %128 = arith.truncf %127 : vector<8x64xf32> to vector<8x64xbf16>
    %c0_45 = arith.constant 0 : index
    %c0_46 = arith.constant 0 : index
    %c0_47 = arith.constant 0 : index
    %129 = vector.load %arg14[%c0_45, %c0_46, %c0_47] : memref<1x64x32xbf16, #tpu.memory_space<vmem>>, vector<1x64x32xbf16>
    %130 = vector.shape_cast %129 : vector<1x64x32xbf16> to vector<64x32xbf16>
    %cst_48 = arith.constant dense<0.000000e+00> : vector<8x32xf32>
    %131 = tpu.matmul %128, %130, %cst_48 {dimension_numbers = #tpu.dot_dimension_numbers<[1], [0], [0], [1], [0, 0, 1, 1], [], []>} : vector<8x64xbf16>, vector<64x32xbf16>, vector<8x32xf32> -> vector<8x32xf32>
    %c0_49 = arith.constant 0 : index
    %c0_50 = arith.constant 0 : index
    %c0_51 = arith.constant 0 : index
    %132 = vector.load %arg15[%c0_49, %c0_50, %c0_51] : memref<1x1x32xf32, #tpu.memory_space<vmem>>, vector<1x1x32xf32>
    %133 = vector.shape_cast %132 : vector<1x1x32xf32> to vector<1x32xf32>
    %134 = vector.broadcast %133 : vector<1x32xf32> to vector<8x32xf32>
    %135 = arith.addf %131, %134 : vector<8x32xf32>
    %136 = arith.addf %135, %106 : vector<8x32xf32>
    %c0_52 = arith.constant 0 : index
    %c0_53 = arith.constant 0 : index
    %c0_54 = arith.constant 0 : index
    %137 = vector.load %arg16[%c0_52, %c0_53, %c0_54] : memref<1x1x32xf32, #tpu.memory_space<vmem>>, vector<1x1x32xf32>
    %138 = vector.shape_cast %137 : vector<1x1x32xf32> to vector<1x32xf32>
    %c0_55 = arith.constant 0 : index
    %c0_56 = arith.constant 0 : index
    %c0_57 = arith.constant 0 : index
    %139 = vector.load %arg17[%c0_55, %c0_56, %c0_57] : memref<1x1x32xf32, #tpu.memory_space<vmem>>, vector<1x1x32xf32>
    %140 = vector.shape_cast %139 : vector<1x1x32xf32> to vector<1x32xf32>
    %cst_58 = arith.constant dense<0.000000e+00> : vector<8xf32>
    %141 = vector.multi_reduction <add>, %136, %cst_58 [1] : vector<8x32xf32> to vector<8xf32>
    %142 = vector.shape_cast %141 : vector<8xf32> to vector<8x1xf32>
    %cst_59 = arith.constant 3.200000e+01 : f32
    %143 = vector.broadcast %cst_59 : f32 to vector<8x1xf32>
    %144 = arith.divf %142, %143 : vector<8x1xf32>
    %145 = vector.broadcast %144 : vector<8x1xf32> to vector<8x32xf32>
    %146 = arith.subf %136, %145 : vector<8x32xf32>
    %147 = arith.mulf %146, %146 : vector<8x32xf32>
    %cst_60 = arith.constant dense<0.000000e+00> : vector<8xf32>
    %148 = vector.multi_reduction <add>, %147, %cst_60 [1] : vector<8x32xf32> to vector<8xf32>
    %149 = vector.shape_cast %148 : vector<8xf32> to vector<8x1xf32>
    %cst_61 = arith.constant 3.200000e+01 : f32
    %150 = vector.broadcast %cst_61 : f32 to vector<8x1xf32>
    %151 = arith.divf %149, %150 : vector<8x1xf32>
    %cst_62 = arith.constant 9.99999996E-13 : f32
    %152 = vector.broadcast %cst_62 : f32 to vector<8x1xf32>
    %153 = arith.addf %151, %152 : vector<8x1xf32>
    %154 = math.rsqrt %153 : vector<8x1xf32>
    %155 = vector.broadcast %154 : vector<8x1xf32> to vector<8x32xf32>
    %156 = arith.mulf %146, %155 : vector<8x32xf32>
    %157 = vector.broadcast %138 : vector<1x32xf32> to vector<8x32xf32>
    %158 = arith.mulf %156, %157 : vector<8x32xf32>
    %159 = vector.broadcast %140 : vector<1x32xf32> to vector<8x32xf32>
    %160 = arith.addf %158, %159 : vector<8x32xf32>
    %c0_63 = arith.constant 0 : index
    %c0_64 = arith.constant 0 : index
    %161 = vector.load %arg23[%c0_63, %c0_64] : memref<8x32xf32, #tpu.memory_space<vmem>>, vector<8x32xf32>
    tpu.vector_store %arg23[%c0_63, %c0_64], %160 {strides = array<i32>} : memref<8x32xf32, #tpu.memory_space<vmem>>, vector<8x32xf32>,
    %c1_i32 = arith.constant 1 : i32
    %162 = arith.cmpi eq, %arg1, %c1_i32 : i32
    %163 = arith.extui %162 : i1 to i32
    %c0_i32_65 = arith.constant 0 : i32
    %164 = arith.cmpi ne, %163, %c0_i32_65 : i32
    scf.if %164 {
      %165 = vector.extract_strided_slice %160 {offsets = [0, 0], sizes = [1, 32], strides = [1, 1]} : vector<8x32xf32> to vector<1x32xf32>
      %166 = arith.truncf %165 : vector<1x32xf32> to vector<1x32xbf16>
      %c0_66 = arith.constant 0 : index
      %c0_67 = arith.constant 0 : index
      %167 = vector.load %arg18[%c0_66, %c0_67] : memref<32x32xbf16, #tpu.memory_space<vmem>>, vector<32x32xbf16>
      %cst_68 = arith.constant dense<0.000000e+00> : vector<1x32xf32>
      %168 = tpu.matmul %166, %167, %cst_68 {dimension_numbers = #tpu.dot_dimension_numbers<[1], [0], [0], [1], [0, 0, 1, 1], [], []>} : vector<1x32xbf16>, vector<32x32xbf16>, vector<1x32xf32> -> vector<1x32xf32>
      %c0_69 = arith.constant 0 : index
      %c0_70 = arith.constant 0 : index
      %169 = vector.load %arg19[%c0_69, %c0_70] : memref<1x32xf32, #tpu.memory_space<vmem>>, vector<1x32xf32>
      %170 = arith.addf %168, %169 : vector<1x32xf32>
      %171 = math.tanh %170 : vector<1x32xf32>
      %172 = arith.truncf %171 : vector<1x32xf32> to vector<1x32xbf16>
      %c0_71 = arith.constant 0 : index
      %c0_72 = arith.constant 0 : index
      %173 = vector.load %arg20[%c0_71, %c0_72] : memref<32x128xbf16, #tpu.memory_space<vmem>>, vector<32x128xbf16>
      %cst_73 = arith.constant dense<0.000000e+00> : vector<1x128xf32>
      %174 = tpu.matmul %172, %173, %cst_73 {dimension_numbers = #tpu.dot_dimension_numbers<[1], [0], [0], [1], [0, 0, 1, 1], [], []>} : vector<1x32xbf16>, vector<32x128xbf16>, vector<1x128xf32> -> vector<1x128xf32>
      %c0_74 = arith.constant 0 : index
      %c0_75 = arith.constant 0 : index
      %175 = vector.load %arg21[%c0_74, %c0_75] : memref<1x128xf32, #tpu.memory_space<vmem>>, vector<1x128xf32>
      %176 = arith.addf %174, %175 : vector<1x128xf32>
      %177 = vector.shape_cast %176 : vector<1x128xf32> to vector<1x1x128xf32>
      %178 = vector.broadcast %177 : vector<1x1x128xf32> to vector<1x8x128xf32>
      %c0_76 = arith.constant 0 : index
      %c0_77 = arith.constant 0 : index
      %c0_78 = arith.constant 0 : index
      %179 = vector.load %arg22[%c0_76, %c0_77, %c0_78] : memref<1x8x128xf32, #tpu.memory_space<vmem>>, vector<1x8x128xf32>
      tpu.vector_store %arg22[%c0_76, %c0_77, %c0_78], %178 {strides = array<i32>} : memref<1x8x128xf32, #tpu.memory_space<vmem>>, vector<1x8x128xf32>,
    } else {
    }
    return
  }
  func.func @transform_0(%arg0: i32, %arg1: i32) -> (i32, i32) {
    %c0_i32 = arith.constant 0 : i32
    %c0_i32_0 = arith.constant 0 : i32
    return %arg0, %c0_i32 : i32, i32
  }
  func.func @transform_1(%arg0: i32, %arg1: i32) -> (i32, i32, i32) {
    %c0_i32 = arith.constant 0 : i32
    %c0_i32_0 = arith.constant 0 : i32
    %c0_i32_1 = arith.constant 0 : i32
    return %arg0, %c0_i32, %c0_i32_0 : i32, i32, i32
  }
  func.func @transform_2(%arg0: i32, %arg1: i32) -> (i32, i32) {
    %c0_i32 = arith.constant 0 : i32
    %c0_i32_0 = arith.constant 0 : i32
    %c0_i32_1 = arith.constant 0 : i32
    return %c0_i32, %c0_i32_0 : i32, i32
  }
  func.func @transform_3(%arg0: i32, %arg1: i32) -> (i32, i32) {
    %c0_i32 = arith.constant 0 : i32
    %c0_i32_0 = arith.constant 0 : i32
    %c0_i32_1 = arith.constant 0 : i32
    return %c0_i32, %c0_i32_0 : i32, i32
  }
  func.func @transform_4(%arg0: i32, %arg1: i32) -> (i32, i32, i32) {
    %c0_i32 = arith.constant 0 : i32
    %c0_i32_0 = arith.constant 0 : i32
    %c0_i32_1 = arith.constant 0 : i32
    return %arg1, %c0_i32, %c0_i32_0 : i32, i32, i32
  }
  func.func @transform_5(%arg0: i32, %arg1: i32) -> (i32, i32, i32) {
    %c0_i32 = arith.constant 0 : i32
    %c0_i32_0 = arith.constant 0 : i32
    %c0_i32_1 = arith.constant 0 : i32
    return %arg1, %c0_i32, %c0_i32_0 : i32, i32, i32
  }
  func.func @transform_6(%arg0: i32, %arg1: i32) -> (i32, i32, i32) {
    %c0_i32 = arith.constant 0 : i32
    %c0_i32_0 = arith.constant 0 : i32
    %c0_i32_1 = arith.constant 0 : i32
    return %arg1, %c0_i32, %c0_i32_0 : i32, i32, i32
  }
  func.func @transform_7(%arg0: i32, %arg1: i32) -> (i32, i32, i32) {
    %c0_i32 = arith.constant 0 : i32
    %c0_i32_0 = arith.constant 0 : i32
    %c0_i32_1 = arith.constant 0 : i32
    return %arg1, %c0_i32, %c0_i32_0 : i32, i32, i32
  }
  func.func @transform_8(%arg0: i32, %arg1: i32) -> (i32, i32, i32) {
    %c0_i32 = arith.constant 0 : i32
    %c0_i32_0 = arith.constant 0 : i32
    %c0_i32_1 = arith.constant 0 : i32
    return %arg1, %c0_i32, %c0_i32_0 : i32, i32, i32
  }
  func.func @transform_9(%arg0: i32, %arg1: i32) -> (i32, i32, i32) {
    %c0_i32 = arith.constant 0 : i32
    %c0_i32_0 = arith.constant 0 : i32
    %c0_i32_1 = arith.constant 0 : i32
    return %arg1, %c0_i32, %c0_i32_0 : i32, i32, i32
  }
  func.func @transform_10(%arg0: i32, %arg1: i32) -> (i32, i32, i32) {
    %c0_i32 = arith.constant 0 : i32
    %c0_i32_0 = arith.constant 0 : i32
    %c0_i32_1 = arith.constant 0 : i32
    return %arg1, %c0_i32, %c0_i32_0 : i32, i32, i32
  }
  func.func @transform_11(%arg0: i32, %arg1: i32) -> (i32, i32, i32) {
    %c0_i32 = arith.constant 0 : i32
    %c0_i32_0 = arith.constant 0 : i32
    %c0_i32_1 = arith.constant 0 : i32
    return %arg1, %c0_i32, %c0_i32_0 : i32, i32, i32
  }
  func.func @transform_12(%arg0: i32, %arg1: i32) -> (i32, i32, i32) {
    %c0_i32 = arith.constant 0 : i32
    %c0_i32_0 = arith.constant 0 : i32
    %c0_i32_1 = arith.constant 0 : i32
    return %arg1, %c0_i32, %c0_i32_0 : i32, i32, i32
  }
  func.func @transform_13(%arg0: i32, %arg1: i32) -> (i32, i32, i32) {
    %c0_i32 = arith.constant 0 : i32
    %c0_i32_0 = arith.constant 0 : i32
    %c0_i32_1 = arith.constant 0 : i32
    return %arg1, %c0_i32, %c0_i32_0 : i32, i32, i32
  }
  func.func @transform_14(%arg0: i32, %arg1: i32) -> (i32, i32, i32) {
    %c0_i32 = arith.constant 0 : i32
    %c0_i32_0 = arith.constant 0 : i32
    %c0_i32_1 = arith.constant 0 : i32
    return %arg1, %c0_i32, %c0_i32_0 : i32, i32, i32
  }
  func.func @transform_15(%arg0: i32, %arg1: i32) -> (i32, i32, i32) {
    %c0_i32 = arith.constant 0 : i32
    %c0_i32_0 = arith.constant 0 : i32
    %c0_i32_1 = arith.constant 0 : i32
    return %arg1, %c0_i32, %c0_i32_0 : i32, i32, i32
  }
  func.func @transform_16(%arg0: i32, %arg1: i32) -> (i32, i32) {
    %c0_i32 = arith.constant 0 : i32
    %c0_i32_0 = arith.constant 0 : i32
    %c0_i32_1 = arith.constant 0 : i32
    return %c0_i32, %c0_i32_0 : i32, i32
  }
  func.func @transform_17(%arg0: i32, %arg1: i32) -> (i32, i32) {
    %c0_i32 = arith.constant 0 : i32
    %c0_i32_0 = arith.constant 0 : i32
    %c0_i32_1 = arith.constant 0 : i32
    return %c0_i32, %c0_i32_0 : i32, i32
  }
  func.func @transform_18(%arg0: i32, %arg1: i32) -> (i32, i32) {
    %c0_i32 = arith.constant 0 : i32
    %c0_i32_0 = arith.constant 0 : i32
    %c0_i32_1 = arith.constant 0 : i32
    return %c0_i32, %c0_i32_0 : i32, i32
  }
  func.func @transform_19(%arg0: i32, %arg1: i32) -> (i32, i32) {
    %c0_i32 = arith.constant 0 : i32
    %c0_i32_0 = arith.constant 0 : i32
    %c0_i32_1 = arith.constant 0 : i32
    return %c0_i32, %c0_i32_0 : i32, i32
  }
  func.func @transform_20(%arg0: i32, %arg1: i32) -> (i32, i32, i32) {
    %c0_i32 = arith.constant 0 : i32
    %c0_i32_0 = arith.constant 0 : i32
    %c0_i32_1 = arith.constant 0 : i32
    return %arg0, %c0_i32, %c0_i32_0 : i32, i32, i32
  }
}

</mosaic_0001>

<bundles_post_ra>
// kernel: bert_classifier_forward.1
= control target key start
LH: loop header
LB: loop body
LE: loop exit
PB: predicated region body
PF: predicated region fallthrough
CT: control target
= control target key end

     0   :  { %s2504_s22 = smov 0   ;;  %s2506_s23 = smov 0   ;;  %s2809_s0 = inlined_call_operand.vmem [shape: f32[16,32], index: 0, kind: input, shape index: {}]   ;;  %s2810_s1 = inlined_call_operand.vmem [shape: f32[2,1,8], index: 1, kind: input, shape index: {}]   ;;  %s2811_s2 = inlined_call_operand.vmem [shape: f32[1,32], index: 2, kind: input, shape index: {}]   ;;  %s2812_s3 = inlined_call_operand.vmem [shape: f32[1,32], index: 3, kind: input, shape index: {}]   ;;  %s2813_s4 = inlined_call_operand.vmem [shape: bf16[2,32,96], index: 4, kind: input, shape index: {}]   ;;  %s2814_s5 = inlined_call_operand.vmem [shape: f32[2,1,96], index: 5, kind: input, shape index: {}]   ;;  %s2815_s6 = inlined_call_operand.vmem [shape: bf16[2,32,32], index: 6, kind: input, shape index: {}]   ;;  %s2816_s7 = inlined_call_operand.vmem [shape: f32[2,1,32], index: 7, kind: input, shape index: {}]   ;;  %s2817_s8 = inlined_call_operand.vmem [shape: f32[2,1,32], index: 8, kind: input, shape index: {}]   ;;  %s2818_s9 = inlined_call_operand.vmem [shape: f32[2,1,32], index: 9, kind: input, shape index: {}]   ;;  %s2819_s10 = inlined_call_operand.vmem [shape: bf16[2,32,64], index: 10, kind: input, shape index: {}]   ;;  %s2820_s11 = inlined_call_operand.vmem [shape: f32[2,1,64], index: 11, kind: input, shape index: {}]   ;;  %s2821_s12 = inlined_call_operand.vmem [shape: bf16[2,64,32], index: 12, kind: input, shape index: {}]   ;;  %s2822_s13 = inlined_call_operand.vmem [shape: f32[2,1,32], index: 13, kind: input, shape index: {}]   ;;  %s2823_s14 = inlined_call_operand.vmem [shape: f32[2,1,32], index: 14, kind: input, shape index: {}]   ;;  %s2824_s15 = inlined_call_operand.vmem [shape: f32[2,1,32], index: 15, kind: input, shape index: {}]   ;;  %s2825_s16 = inlined_call_operand.vmem [shape: bf16[32,32], index: 16, kind: input, shape index: {}]   ;;  %s2826_s17 = inlined_call_operand.vmem [shape: f32[1,32], index: 17, kind: input, shape index: {}]   ;;  %s2827_s18 = inlined_call_operand.vmem [shape: bf16[32,128], index: 18, kind: input, shape index: {}]   ;;  %s2828_s19 = inlined_call_operand.vmem [shape: f32[1,128], index: 19, kind: input, shape index: {}]   ;;  %s2829_s20 = inlined_call_operand.vmem [shape: f32[2,8,128], index: 20, kind: output, shape index: {}]  }
   0x1   :  { %2837 = sst [smem:[#allocation10_spill]] %s2809_s0  ;;  %s2508_s24 = smov 0  }
   0x2   :  { %2838 = sst [smem:[#allocation11_spill]] %s2810_s1  ;;  %s2502_s1 = smov 0  }
   0x3   :  { %2839 = sst [smem:[#allocation12_spill]] %s2811_s2  ;;  %s2510_s2 = smov 0  }
   0x4   :  { %2840 = sst [smem:[#allocation13_spill]] %s2812_s3 }
   0x5   :  { %2841 = sst [smem:[#allocation14_spill]] %s2813_s4 }
   0x6   :  { %2842 = sst [smem:[#allocation15_spill]] %s2815_s6 }
   0x7   :  { %2843 = sst [smem:[#allocation16_spill]] %s2819_s10 }
   0x8   :  { %2844 = sst [smem:[#allocation17_spill]] %s2820_s11 }
   0x9   :  { %2845 = sst [smem:[#allocation18_spill]] %s2824_s15 }
   0xa   :  { %2846 = sst [smem:[#allocation19_spill]] %s2825_s16 }
   0xb   :  { %2847 = sst [smem:[#allocation20_spill]] %s2826_s17 }
   0xc   :  { %2848 = sst [smem:[#allocation21_spill]] %s2827_s18 }
   0xd   :  { %2849 = sst [smem:[#allocation22_spill]] %s2828_s19 }
   0xe   :  { %2850 = sst [smem:[#allocation23_spill]] %s2829_s20 }
   0xf LB: > { %2851 = sst [smem:[#allocation3_spill]] %s2367_s1  ;;  %s39_s25 = sadd.s32 1, %s2375_s23  ;;  %s2383_s2 = sphi %s2510_s2, %s30_s2   ;;  %s2379_s24 = sphi %s2508_s24, %s2888_s24   ;;  %s2375_s23 = sphi %s2506_s23, %s2887_s23   ;;  %s2371_s22 = sphi %s2504_s22, %s2886_s22   ;;  %s2367_s1 = sphi %s2502_s1, %s2885_s1  }
  0x10   : > { %2852 = sst [smem:[#allocation4_spill]] %s2375_s23  ;;  %s42_s3 = sadd.s32 1, %s2379_s24 }
  0x11   : > { %2853 = sst [smem:[#allocation5_spill]] %s2379_s24  ;;  %p40_p0 = scmp.ge.s32.totalorder %s39_s25, 2 }
  0x12   : > { %2854 = sst [smem:[#allocation6_spill]] %s2383_s2  ;;  %p2059_p1 = scmp.ge.s32.totalorder %s2383_s2, 1 }
  0x13   : > { %p685_p2 = scmp.lt.s32.totalorder %s2383_s2, 5  ;;  %s2890_s25 = smov (%p40_p0, %s39_s25), 0 }
  0x14   : > { %2855 = sst [smem:[#allocation7_spill]] %s2890_s25  ;;  %s2892_s3 = smov (!%p40_p0, %s42_s3), %s2379_s24 }
  0x15   : > { %p686_p3 = pnand %p2059_p1, %p685_p2  ;;  %p44_p4 = scmp.ge.s32.totalorder %s2892_s3, 2 }
  0x17   : > { %s2894_s3 = smov (%p44_p4, %s2892_s3), 0  ;;  %689 = sbr.rel (%p686_p3) target bundleno = 3441 (0xd71), region = 100 }
  0x18   : > { %2856 = sst [smem:[#allocation8_spill]] %s2894_s3 }
  0x1e   : > { %p788_p5 = scmp.lt.s32.totalorder %s2371_s22, 1  ;;  %p795_p6 = scmp.lt.s32.totalorder %s2367_s1, 1 }
  0x1f   : > { %s2859_s3 = sld [smem:[#allocation10_spill]]  ;;  %s2860_s19 = sld [smem:[#allocation14_spill]] }
  0x20   : > { %s2896_s22 = smov (!%p788_p5, %s2371_s22), 1  ;;  %s2861_s6 = sld [smem:[#allocation15_spill]] }
  0x21   : > { %2857 = sst [smem:[#allocation9_spill]] %s2896_s22  ;;  %s2060_s27 = sshll.u32 %s2896_s22, 3 }
  0x22   : > { %s2538_s26 = scalar_select %p795_p6, %s2367_s1, 1 }
  0x23   : > { %s2862_s10 = sld [smem:[#allocation16_spill]]  ;;  %s2864_s2 = sld [smem:[#allocation18_spill]] }
  0x24   : > { %s2113_s24 = sshll.u32 %s2538_s26, 4  ;;  %s832_s0 = scalar_lea.vmem %s2822_s13, %s2538_s26 }
  0x25   : > { %s791_s25 = scalar_lea.vmem %s2859_s3, %s2060_s27  ;;  %s2552_s17 = scalar_lea.vmem %s2860_s19, %s2113_s24 }
  0x26   : > { %s2561_s28 = scalar_lea.vmem %s2861_s6, %s2113_s24  ;;  %s2116_s6 = sshll.u32 %s2538_s26, 5 }
  0x27   : > { %s2592_s30 = scalar_lea.vmem %s2821_s12, %s2116_s6  ;;  %s835_s22 = scalar_lea.vmem %s2823_s14, %s2538_s26 }
  0x28   : > { %s2865_s1 = sld [smem:[#allocation23_spill]]  ;;  %s2866_s4 = sld [smem:[#allocation3_spill]] }
  0x29   : > { %s2578_s18 = scalar_lea.vmem %s2862_s10, %s2113_s24  ;;  %s838_s10 = scalar_lea.vmem %s2864_s2, %s2538_s26 }
  0x2e   : > { %s2605_s11 = scalar_lea.vmem %s2865_s1, %s2060_s27  ;;  %p2070_p7 = scmp.ne.s32.totalorder %s2866_s4, 0 }
  0x2f   : > { %v848_v0 = vld [vmem:[%s791_s25] sm:$0xff] (!%p2070_p7)  ;;  %vm851_vm0 = vcmask (!%p2070_p7), 261120   ;;  %s2867_s27 = sld [smem:[#allocation12_spill]] (!%p2070_p7)  ;;  %s2868_s29 = sld [smem:[#allocation13_spill]] (!%p2070_p7) }
  0x30   : > { %847 = sbr.rel (%p2070_p7) target bundleno = 362 (0x16a), region = 104  ;;  %v852_v1 = vsel (!%p2070_p7), %vm851_vm0, %v848_v0, 0.0 }
  0x31   : > { %853 = vadd.xlane.f32.xlu0 (!%p2070_p7), %v852_v1 }
  0x35   : > { %v2071_v11 = vld [vmem:[%s2867_s27] ss:$0 sm:$0xff] (!%p2070_p7) }
  0x36   : > { %v2072_v13 = vld [vmem:[%s2868_s29] ss:$0 sm:$0xff] (!%p2070_p7) }
  0xbe   : > { %v854_v2 = vpop.xlane.xlu0 %853 }
  0xbf   : > { %v856_v3 = vmul.f32 0.03125, %v854_v2 }
  0xc1   : > { %v857_v4 = vsub.f32 %v848_v0, %v856_v3 }
  0xc3   : > { %v858_v5 = vmul.f32 %v857_v4, %v857_v4 }
  0xc5   : > { %v859_v6 = vsel %vm851_vm0, %v858_v5, 0.0 }
  0xc6   : > { %860 = vadd.xlane.f32.xlu0 %v859_v6 }
 0x153   : > { %v861_v7 = vpop.xlane.xlu0 %860 }
 0x154   : > { %v862_v8 = vmul.f32 0.03125, %v861_v7 }
 0x156   : > { %v863_v9 = vadd.f32 1e-12, %v862_v8 }
 0x158   : > { %2305 = vrsqrt.f32 %v863_v9 }
 0x162   : > { %v2306_v10 = vpop.eup %2305 }
 0x163   : > { %v865_v12 = vmul.f32 %v2306_v10, %v857_v4 }
 0x165   : > { %v872_v14 = vmul.f32 %v2071_v11, %v865_v12 }
 0x167   : > { %v879_v15 = vadd.f32 %v2072_v13, %v872_v14 }
 0x169   : > { %880 = vst.msk [vmem:[#allocation2] sm:$0xff] %vm851_vm0, %v879_v15 }
 0x16a PF: > { %v2307_v16 = vld [vmem:[%s2552_s17] sm:$0xff]   ;;  %v2385_v17 = vmov 0.0   ;;  %v2308_v18 = vld [vmem:[%s2552_s17 + $0x8] sm:$0xff]   ;;  %vm2386_vm1 = vmmov 0   ;;  %vm906_vm2 = vcmask 261120   ;;  %s2869_s21 = scalar_lea.vmem %s2814_s5, %s2538_s26  ;;  %s2387_s23 = smov 104  }
 0x16b   : > { %2153 = vmatprep.subr.bf16.mxu0 %v2385_v17  ;;  %2161 = vmatprep.subr.bf16.mxu1 %v2385_v17  ;;  %v2073_v21 = vld [vmem:[%s2869_s21] ss:$0 sm:$0xff]  ;;  %s2388_s19 = smov 120   ;;  %s2389_s24 = smov 112   ;;  %vm989_vm3 = vcmask 64512   ;;  %vm1236_vm4 = vcmask 1043456  }
 0x16c   : > { %2154 = vmatpush3.bf16.msra.mxu0 %v2307_v16  ;;  %2157 = vmatprep.mubr.msk.bf16.mxu0 %vm2386_vm1, %v2385_v17  ;;  %s2390_s16 = smov 96   ;;  %s2870_s15 = sld [smem:[#allocation9_spill]]  ;;  %vm1437_vm5 = vcmask 130048   ;;  %vm1439_vm6 = vcmask 195584   ;;  %vm1655_vm7 = vcmask 523264  }
 0x16d   : > { %2155 = vmatprep.subr.bf16.mxu0 %v2385_v17  ;;  %2163 = vmatprep.mubr.msk.bf16.mxu1 %vm2386_vm1, %v2385_v17  ;;  %s2871_s6 = sld [smem:[#allocation11_spill]]  ;;  %s2391_s27 = smov 64  }
 0x16e   : > { %s2392_s25 = smov 8   ;;  %s2393_s2 = smov 16  }
 0x16f   : > { %s2394_s29 = smov 24   ;;  %s2873_s3 = scalar_lea.vmem %s2816_s7, %s2538_s26 }
 0x170   : > { %v2623_v19 = vld [vmem:[#allocation2] sm:$0xff]  ;;  %2156 = vmatpush3.bf16.msra.mxu0 %v2308_v18  ;;  %s2876_s4 = sld [smem:[#allocation17_spill]] }
 0x171   : > { %v882_v20 = vpack.c.bf16 %v2623_v19, %v2623_v19  ;;  %2167 = vmatprep.subr.bf16.mxu0 %v2385_v17 }
 0x173   : > { %2158 = vmatmul.mubr.msk.bf16.vlgmr.msra.gmra.mrb[0].mxu0 %vm906_vm2, %v882_v20  ;;  %s2872_s1 = scalar_lea.vmem %s2871_s6, %s2870_s15  ;;  %s2875_s15 = scalar_lea.vmem %s2818_s9, %s2538_s26 }
 0x174   : > { %2169 = vmatprep.mubr.msk.bf16.mxu0 %vm2386_vm1, %v2385_v17  ;;  %v2077_v50 = vld [vmem:[%s2872_s1] ss:$0 sm:$0xff] }
 0x176   : > { %s2877_s6 = scalar_lea.vmem %s2876_s4, %s2538_s26 }
 0x246   : > { %v944_v22 = vpop.f32.mrb[0].mxu0 }
 0x247   : > { %v945_v23 = vadd.f32 %v2073_v21, %v944_v22  ;;  %v2159_v24 = vpop.f32.mrb[1].mxu0 }
 0x248   : > { %v947_v25 = vpop.f32.mrb[2].mxu0 }
 0x249   : > { %972 = vrot.lane.b32.xlu1 %v945_v23, %s2387_s23  ;;  %966 = vrot.lane.b32.xlu0 %v945_v23, %s2388_s19  ;;  %v2160_v26 = vpop.f32.mrb[3].mxu0  ;;  %v2639_v27 = vpack.c.bf16 %v945_v23, %v945_v23  ;;  %v950_v28 = vmul.f32 0.35355338, %v945_v23 }
 0x24b   : > { %v961_v37 = vpack.c.bf16 %v950_v28, %v950_v28 }
 0x24d   : > { %969 = vrot.lane.b32.xlu0 %v945_v23, %s2389_s24  ;;  %987 = vrot.lane.b32.xlu1 %v2639_v27, %s2390_s16 }
 0x251   : > { %952 = vrot.lane.b32.xlu1 %v950_v28, %s2388_s19  ;;  %s2874_s19 = scalar_lea.vmem %s2817_s8, %s2538_s26 }
 0x2bb   : > { %v973_v29 = vpop.permute.xlu1 %972  ;;  %v967_v30 = vpop.permute.xlu0 %966 }
 0x2bc   : > { %v2642_v31 = vpack.c.bf16 %v973_v29, %v973_v29  ;;  %v2644_v32 = vpack.c.bf16 %v967_v30, %v967_v30 }
 0x2be   : > { %1037 = vrot.lane.b32.xlu0 %v2644_v32, %s2390_s16  ;;  %1135 = vrot.lane.b32.xlu1 %v2642_v31, %s2390_s16 }
 0x2bf   : > { %v970_v33 = vpop.permute.xlu0 %969  ;;  %v988_v34 = vpop.permute.xlu1 %987 }
 0x2c0   : > { %v2648_v35 = vpack.c.bf16 %v970_v33, %v970_v33  ;;  %v994_v36 = vsel %vm989_vm3, %v988_v34, 0 }
 0x2c1   : > { %2162 = vmatpush3.bf16.xpose.msra.mxu1 %v994_v36 }
 0x2c2   : > { %1086 = vrot.lane.b32.xlu0 %v2648_v35, %s2390_s16  ;;  %958 = vrot.lane.b32.xlu1 %v950_v28, %s2387_s23 }
 0x2c3   : > { %2173 = vmatprep.subr.bf16.mxu1 %v2385_v17  ;;  %v953_v40 = vpop.permute.xlu1 %952 }
 0x2c4   : > { %v962_v44 = vpack.c.bf16 %v953_v40, %v953_v40 }
 0x2c6   : > { %955 = vrot.lane.b32.xlu0 %v950_v28, %s2389_s24 }
 0x2c8   : > { %2164 = vmatmul.mubr.msk.bf16.vlgmr.msra.gmra.mrb[0].mxu1 %vm989_vm3, %v961_v37 }
 0x2c9   : > { %2175 = vmatprep.mubr.msk.bf16.mxu1 %vm2386_vm1, %v2385_v17 }
 0x330   : > { %v1038_v38 = vpop.permute.xlu0 %1037  ;;  %v1136_v43 = vpop.permute.xlu1 %1135 }
 0x331   : > { %v1043_v39 = vsel %vm989_vm3, %v1038_v38, 0  ;;  %v1141_v46 = vsel %vm989_vm3, %v1136_v43, 0 }
 0x332   : > { %2168 = vmatpush3.bf16.xpose.msra.mxu0 %v1043_v39 }
 0x333   : > { %2179 = vmatprep.subr.bf16.mxu0 %v2385_v17 }
 0x334   : > { %v1087_v41 = vpop.permute.xlu0 %1086  ;;  %v959_v48 = vpop.permute.xlu1 %958 }
 0x335   : > { %v1092_v42 = vsel %vm989_vm3, %v1087_v41, 0  ;;  %v964_v49 = vpack.c.bf16 %v959_v48, %v959_v48 }
 0x336   : > { %2174 = vmatpush3.bf16.xpose.msra.mxu1 %v1092_v42 }
 0x337   : > { %2185 = vmatprep.subr.bf16.mxu1 %v2385_v17 }
 0x338   : > { %v956_v45 = vpop.permute.xlu0 %955 }
 0x339   : > { %2170 = vmatmul.mubr.msk.bf16.vlgmr.msra.gmra.mrb[4].mxu0 %vm989_vm3, %v962_v44  ;;  %v963_v47 = vpack.c.bf16 %v956_v45, %v956_v45 }
 0x33a   : > { %2180 = vmatpush3.bf16.xpose.msra.mxu0 %v1141_v46  ;;  %2181 = vmatprep.mubr.msk.bf16.mxu0 %vm2386_vm1, %v2385_v17 }
 0x33b   : > { %2191 = vmatprep.subr.bf16.mxu0 %v2385_v17 }
 0x33d   : > { %2176 = vmatmul.mubr.msk.bf16.vlgmr.msra.gmra.mrb[4].mxu1 %vm989_vm3, %v963_v47 }
 0x33e   : > { %2187 = vmatprep.mubr.msk.bf16.mxu1 %vm2386_vm1, %v2385_v17 }
 0x341   : > { %2182 = vmatmul.mubr.msk.bf16.vlgmr.msra.gmra.mrb[8].mxu0 %vm989_vm3, %v964_v49 }
 0x342   : > { %2193 = vmatprep.mubr.msk.bf16.mxu0 %vm2386_vm1, %v2385_v17 }
 0x39b   : > { %v1030_v51 = vpop.f32.mrb[0].mxu1 }
 0x39c   : > { %v1031_v52 = vadd.f32 %v2077_v50, %v1030_v51  ;;  %v2165_v53 = vpop.f32.mrb[1].mxu1 }
 0x39d   : > { %v1033_v54 = vpop.f32.mrb[2].mxu1 }
 0x39e   : > { %v2166_v55 = vpop.f32.mrb[3].mxu1  ;;  %v1183_v56 = vsel %vm989_vm3, %v1031_v52, -inf }
 0x39f   : > { %1184 = vmax.xlane.f32.xlu0 %v1183_v56 }
 0x40c   : > { %v1079_v57 = vpop.f32.mrb[4].mxu0 }
 0x40d   : > { %v1080_v58 = vadd.f32 %v2077_v50, %v1079_v57  ;;  %v2171_v59 = vpop.f32.mrb[5].mxu0 }
 0x40e   : > { %v1082_v60 = vpop.f32.mrb[6].mxu0 }
 0x40f   : > { %v2172_v61 = vpop.f32.mrb[7].mxu0  ;;  %v1186_v62 = vsel %vm989_vm3, %v1080_v58, -inf }
 0x410   : > { %v1128_v63 = vpop.f32.mrb[4].mxu1  ;;  %1187 = vmax.xlane.f32.xlu1 %v1186_v62  ;;  %v2309_v61 = vld [vmem:[%s2561_s28] sm:$0xff]   ;;  %v2310_v62 = vld [vmem:[%s2561_s28 + $0x8] sm:$0xff]   ;;  %s2879_s28 = sld [smem:[#allocation3_spill]] }
 0x411   : > { %v1129_v0 = vadd.f32 %v2077_v50, %v1128_v63  ;;  %v2177_v1 = vpop.f32.mrb[5].mxu1 }
 0x412   : > { %v1131_v2 = vpop.f32.mrb[6].mxu1 }
 0x413   : > { %v2178_v3 = vpop.f32.mrb[7].mxu1  ;;  %v1189_v4 = vsel %vm989_vm3, %v1129_v0, -inf }
 0x414   : > { %1190 = vmax.xlane.f32.xlu0 %v1189_v4  ;;  %v1177_v5 = vpop.f32.mrb[8].mxu0 }
 0x415   : > { %v1178_v6 = vadd.f32 %v2077_v50, %v1177_v5  ;;  %v2183_v7 = vpop.f32.mrb[9].mxu0 }
 0x416   : > { %v1180_v8 = vpop.f32.mrb[10].mxu0  ;;  %p2104_p8 = scmp.ne.s32.totalorder %s2879_s28, 1 }
 0x417   : > { %v2184_v9 = vpop.f32.mrb[11].mxu0  ;;  %v1192_v10 = vsel %vm989_vm3, %v1178_v6, -inf  ;;  %s2880_s21 = sld [smem:[#allocation19_spill]] (!%p2104_p8)  ;;  %vm2396_vm8 = vmmov (!%p2104_p8), 0   ;;  %s2882_s20 = sld [smem:[#allocation20_spill]] (!%p2104_p8) }
 0x418   : > { %1193 = vmax.xlane.f32.xlu0 %v1192_v10 }
 0x421   : > { %1231 = vrot.lane.b32.xlu1 %v2639_v27, %s2391_s27 }
 0x42c   : > { %v1185_v11 = vpop.xlane.xlu0 %1184 }
 0x42d   : > { %v1195_v12 = vsub.f32 %v1031_v52, %v1185_v11 }
 0x42f   : > { %v1199_v13 = vmul.f32 1.442695, %v1195_v12 }
 0x431   : > { %2317 = vpow2.f32 %v1199_v13 }
 0x43b   : > { %v2318_v14 = vpop.eup %2317 }
 0x43c   : > { %v1207_v15 = vsel %vm989_vm3, %v2318_v14, 0.0 }
 0x445   : > { %1208 = vadd.xlane.f32.xlu1 %v1207_v15 }
 0x49d   : > { %v1188_v16 = vpop.xlane.xlu1 %1187 }
 0x49e   : > { %v1196_v18 = vsub.f32 %v1080_v58, %v1188_v16 }
 0x4a0   : > { %v1201_v20 = vmul.f32 1.442695, %v1196_v18 }
 0x4a1   : > { %v1191_v21 = vpop.xlane.xlu0 %1190  ;;  %v1232_v22 = vpop.permute.xlu1 %1231 }
 0x4a2   : > { %2319 = vpow2.f32 %v1201_v20  ;;  %v1197_v23 = vsub.f32 %v1129_v0, %v1191_v21  ;;  %v1238_v24 = vsel %vm1236_vm4, %v1232_v22, 0  ;;  %v2086_v20 = vld [vmem:[%s2873_s3] ss:$0 sm:$0xff] }
 0x4a3   : > { %2186 = vmatpush3.bf16.msra.mxu1 %v1238_v24 }
 0x4a4   : > { %v1203_v25 = vmul.f32 1.442695, %v1197_v23  ;;  %2197 = vmatprep.subr.bf16.mxu1 %v2385_v17 }
 0x4a5   : > { %v1194_v26 = vpop.xlane.xlu0 %1193 }
 0x4a6   : > { %2321 = vpow2.f32 %v1203_v25  ;;  %v1198_v27 = vsub.f32 %v1178_v6, %v1194_v26 }
 0x4a8   : > { %v1205_v28 = vmul.f32 1.442695, %v1198_v27 }
 0x4aa   : > { %2323 = vpow2.f32 %v1205_v28 }
 0x4ac   : > { %v2320_v29 = vpop.eup %2319 }
 0x4ad   : > { %v1210_v30 = vsel %vm989_vm3, %v2320_v29, 0.0 }
 0x4ae   : > { %1211 = vadd.xlane.f32.xlu0 %v1210_v30 }
 0x4b0   : > { %v2322_v33 = vpop.eup %2321 }
 0x4b1   : > { %v1213_v34 = vsel %vm989_vm3, %v2322_v33, 0.0 }
 0x4b2   : > { %1214 = vadd.xlane.f32.xlu1 %v1213_v34 }
 0x4b4   : > { %v2324_v36 = vpop.eup %2323 }
 0x4b5   : > { %v1216_v37 = vsel %vm989_vm3, %v2324_v36, 0.0 }
 0x4b6   : > { %1217 = vadd.xlane.f32.xlu0 %v1216_v37  ;;  %v2312_v37 = vld [vmem:[%s2578_s18 + $0x8] sm:$0xff]  }
 0x4c3   : > { %1328 = vrot.lane.b32.xlu1 %v2648_v35, %s2391_s27 }
 0x4c7   : > { %1376 = vrot.lane.b32.xlu1 %v2642_v31, %s2391_s27 }
 0x4cc   : > { %1280 = vrot.lane.b32.xlu0 %v2644_v32, %s2391_s27 }
 0x4d2   : > { %v1209_v38 = vpop.xlane.xlu1 %1208 }
 0x4d3   : > { %2325 = vrcp.f32 %v1209_v38 }
 0x4dd   : > { %v2326_v39 = vpop.eup %2325 }
 0x4de   : > { %v1223_v40 = vmul.f32 %v2326_v39, %v2318_v14 }
 0x4e0   : > { %v1227_v41 = vpack.c.bf16 %v1223_v40, %v1223_v40 }
 0x4e2   : > { %2188 = vmatmul.mubr.msk.bf16.vlgmr.msra.gmra.mrb[8].mxu1 %vm989_vm3, %v1227_v41  ;;  %v2090_v41 = vld [vmem:[%s2874_s19] ss:$0 sm:$0xff]  ;;  %s2881_s19 = sld [smem:[#allocation21_spill]] (!%p2104_p8) }
 0x4e3   : > { %2199 = vmatprep.mubr.msk.bf16.mxu1 %vm2386_vm1, %v2385_v17 }
 0x53b   : > { %v1212_v42 = vpop.xlane.xlu0 %1211 }
 0x53c   : > { %2327 = vrcp.f32 %v1212_v42 }
 0x53f   : > { %v1215_v43 = vpop.xlane.xlu1 %1214 }
 0x540   : > { %2329 = vrcp.f32 %v1215_v43  ;;  %v2091_v43 = vld [vmem:[%s2875_s15] ss:$0 sm:$0xff] }
 0x543   : > { %v1329_v35 = vpop.permute.xlu1 %1328  ;;  %v1218_v44 = vpop.xlane.xlu0 %1217 }
 0x544   : > { %v1334_v31 = vsel %vm1236_vm4, %v1329_v35, 0  ;;  %2331 = vrcp.f32 %v1218_v44 }
 0x545   : > { %2198 = vmatpush3.bf16.msra.mxu1 %v1334_v31 }
 0x546   : > { %v2328_v32 = vpop.eup %2327  ;;  %2209 = vmatprep.subr.bf16.mxu1 %v2385_v17 }
 0x547   : > { %v1224_v45 = vmul.f32 %v2328_v32, %v2320_v29  ;;  %v1281_v46 = vpop.permute.xlu0 %1280  ;;  %v1377_v48 = vpop.permute.xlu1 %1376  ;;  %v2313_v32 = vld [vmem:[%s2592_s30] sm:$0xff]  }
 0x548   : > { %v1286_v47 = vsel %vm1236_vm4, %v1281_v46, 0  ;;  %v1382_v52 = vsel %vm1236_vm4, %v1377_v48, 0  ;;  %v2315_v46 = vld [vmem:[%s2592_s30 + $0x10] sm:$0xff]   ;;  %v2092_v48 = vld [vmem:[%s2877_s6] ss:$0 sm:$0xff] }
 0x549   : > { %2192 = vmatpush3.bf16.msra.mxu0 %v1286_v47  ;;  %v1228_v49 = vpack.c.bf16 %v1224_v45, %v1224_v45  ;;  %v2314_v45 = vld [vmem:[%s2592_s30 + $0x8] sm:$0xff]   ;;  %v2316_v47 = vld [vmem:[%s2592_s30 + $0x18] sm:$0xff]   ;;  %s2883_s30 = sld [smem:[#allocation22_spill]] (!%p2104_p8) }
 0x54a   : > { %v2330_v50 = vpop.eup %2329  ;;  %2203 = vmatprep.subr.bf16.mxu0 %v2385_v17 }
 0x54b   : > { %v1225_v51 = vmul.f32 %v2330_v50, %v2322_v33 }
 0x54c   : > { %2194 = vmatmul.mubr.msk.bf16.vlgmr.msra.gmra.mrb[12].mxu0 %vm989_vm3, %v1228_v49 }
 0x54d   : > { %2204 = vmatpush3.bf16.msra.mxu0 %v1382_v52  ;;  %v1229_v53 = vpack.c.bf16 %v1225_v51, %v1225_v51  ;;  %2205 = vmatprep.mubr.msk.bf16.mxu0 %vm2386_vm1, %v2385_v17 }
 0x54e   : > { %v2332_v54 = vpop.eup %2331  ;;  %2217 = vmatprep.subr.bf16.mxu0 %v2385_v17 }
 0x54f   : > { %v1226_v55 = vmul.f32 %v2332_v54, %v2324_v36  ;;  %2200 = vmatmul.mubr.msk.bf16.vlgmr.msra.gmra.mrb[12].mxu1 %vm989_vm3, %v1229_v53  ;;  %v2311_v36 = vld [vmem:[%s2578_s18] sm:$0xff]  }
 0x550   : > { %2213 = vmatprep.mubr.msk.bf16.mxu1 %vm2386_vm1, %v2385_v17  ;;  %2210 = vmatpush3.bf16.msra.mxu1 %v2309_v61 }
 0x551   : > { %v1230_v56 = vpack.c.bf16 %v1226_v55, %v1226_v55  ;;  %2211 = vmatprep.subr.bf16.mxu1 %v2385_v17 }
 0x554   : > { %2206 = vmatmul.mubr.msk.bf16.vlgmr.msra.gmra.mrb[16].mxu0 %vm989_vm3, %v1230_v56  ;;  %2212 = vmatpush3.bf16.msra.mxu1 %v2310_v62 }
 0x555   : > { %2221 = vmatprep.mubr.msk.bf16.mxu0 %vm2386_vm1, %v2385_v17  ;;  %2225 = vmatprep.subr.bf16.mxu1 %v2385_v17 }
 0x556   : > { %2218 = vmatpush3.bf16.msra.mxu0 %v2311_v36 }
 0x557   : > { %2219 = vmatprep.subr.bf16.mxu0 %v2385_v17 }
 0x55a   : > { %2220 = vmatpush3.bf16.msra.mxu0 %v2312_v37 }
 0x5b5   : > { %v1274_v57 = vpop.f32.mrb[8].mxu1 }
 0x5b6   : > { %v2189_v58 = vpop.f32.mrb[9].mxu1 }
 0x5b7   : > { %v1277_v59 = vpop.f32.mrb[10].mxu1 }
 0x5b8   : > { %v2190_v60 = vpop.f32.mrb[11].mxu1 }
 0x61f   : > { %v1322_v63 = vpop.f32.mrb[12].mxu0 }
 0x620   : > { %1425 = vrot.lane.b32.xlu0 %v1322_v63, %s2392_s25  ;;  %v2195_v0 = vpop.f32.mrb[13].mxu0  ;;  %v2096_v63 = vld [vmem:[%s832_s0] ss:$0 sm:$0xff] }
 0x621   : > { %v1325_v1 = vpop.f32.mrb[14].mxu0 }
 0x622   : > { %v2196_v2 = vpop.f32.mrb[15].mxu0  ;;  %v1370_v3 = vpop.f32.mrb[12].mxu1 }
 0x623   : > { %1429 = vrot.lane.b32.xlu1 %v1370_v3, %s2393_s2  ;;  %v2201_v4 = vpop.f32.mrb[13].mxu1 }
 0x624   : > { %v1373_v5 = vpop.f32.mrb[14].mxu1 }
 0x625   : > { %v2202_v6 = vpop.f32.mrb[15].mxu1 }
 0x627   : > { %v1418_v7 = vpop.f32.mrb[16].mxu0 }
 0x628   : > { %1433 = vrot.lane.b32.xlu0 %v1418_v7, %s2394_s29  ;;  %v2207_v8 = vpop.f32.mrb[17].mxu0 }
 0x629   : > { %v1421_v9 = vpop.f32.mrb[18].mxu0 }
 0x62a   : > { %v2208_v10 = vpop.f32.mrb[19].mxu0 }
 0x692   : > { %v1426_v11 = vpop.permute.xlu0 %1425 }
 0x693   : > { %v1436_v13 = vsel %vm989_vm3, %v1274_v57, %v1426_v11 }
 0x695   : > { %v1430_v12 = vpop.permute.xlu1 %1429 }
 0x696   : > { %v1438_v14 = vsel %vm1437_vm5, %v1436_v13, %v1430_v12 }
 0x69a   : > { %v1434_v15 = vpop.permute.xlu0 %1433 }
 0x69b   : > { %v1440_v16 = vsel %vm1439_vm6, %v1438_v14, %v1434_v15 }
 0x69c   : > { %v1441_v18 = vpack.c.bf16 %v1440_v16, %v1440_v16  ;;  %v2102_v16 = vld [vmem:[%s835_s22] ss:$0 sm:$0xff] }
 0x69e   : > { %2214 = vmatmul.mubr.msk.bf16.vlgmr.msra.gmra.mrb[16].mxu1 %vm906_vm2, %v1441_v18 }
 0x69f   : > { %2233 = vmatprep.mubr.msk.bf16.mxu1 %vm2386_vm1, %v2385_v17  ;;  %2226 = vmatpush3.bf16.msra.mxu1 %v2313_v32 }
 0x6a0   : > { %2227 = vmatprep.subr.bf16.mxu1 %v2385_v17 }
 0x6a3   : > { %2228 = vmatpush3.bf16.msra.mxu1 %v2314_v45 }
 0x6a4   : > { %2229 = vmatprep.subr.bf16.mxu1 %v2385_v17 }
 0x6a7   : > { %2230 = vmatpush3.bf16.msra.mxu1 %v2315_v46 }
 0x6a8   : > { %2231 = vmatprep.subr.bf16.mxu1 %v2385_v17 }
 0x6ab   : > { %2232 = vmatpush3.bf16.msra.mxu1 %v2316_v47 }
 0x771   : > { %v1502_v21 = vpop.f32.mrb[16].mxu1 }
 0x772   : > { %v1503_v22 = vadd.f32 %v2086_v20, %v1502_v21  ;;  %v2215_v23 = vpop.f32.mrb[17].mxu1  ;;  %v2103_v20 = vld [vmem:[%s838_s10] ss:$0 sm:$0xff] }
 0x773   : > { %v1505_v24 = vpop.f32.mrb[18].mxu1  ;;  %v2339_v23 = vld [vmem:[%s2880_s21] sm:$0xff] (!%p2104_p8)  }
 0x774   : > { %v2216_v25 = vpop.f32.mrb[19].mxu1  ;;  %v1508_v26 = vadd.f32 %v1503_v22, %v2623_v19  ;;  %v2395_v24 = vmov (!%p2104_p8), 0.0  }
 0x775   : > { %2237 = vmatprep.subr.bf16.mxu0 (!%p2104_p8), %v2395_v24  ;;  %2245 = vmatprep.subr.bf16.mxu1 (!%p2104_p8), %v2395_v24  ;;  %v2340_v25 = vld [vmem:[%s2880_s21 + $0x8] sm:$0xff] (!%p2104_p8)  }
 0x776   : > { %v1511_v27 = vsel %vm906_vm2, %v1508_v26, 0.0 }
 0x777   : > { %1512 = vadd.xlane.f32.xlu1 %v1511_v27  ;;  %v2341_v27 = vld [vmem:[%s2881_s19] sm:$0xff] (!%p2104_p8)  }
 0x804   : > { %v1513_v28 = vpop.xlane.xlu1 %1512 }
 0x805   : > { %v1515_v29 = vmul.f32 0.03125, %v1513_v28  ;;  %v2342_v28 = vld [vmem:[%s2881_s19 + $0x8] sm:$0xff] (!%p2104_p8)  }
 0x807   : > { %v1516_v30 = vsub.f32 %v1508_v26, %v1515_v29  ;;  %v1739_v29 = vld [vmem:[%s2882_s20] sm:$0x1] (!%p2104_p8) }
 0x809   : > { %v1517_v33 = vmul.f32 %v1516_v30, %v1516_v30 }
 0x80b   : > { %v1518_v34 = vsel %vm906_vm2, %v1517_v33, 0.0 }
 0x80c   : > { %1519 = vadd.xlane.f32.xlu0 %v1518_v34 }
 0x899   : > { %v1520_v19 = vpop.xlane.xlu0 %1519 }
 0x89a   : > { %v1521_v38 = vmul.f32 0.03125, %v1520_v19 }
 0x89c   : > { %v1522_v39 = vadd.f32 1e-12, %v1521_v38 }
 0x89e   : > { %2333 = vrsqrt.f32 %v1522_v39  ;;  %v1857_v39 = vlaneseq (!%p2104_p8) }
 0x8a8   : > { %v2334_v40 = vpop.eup %2333 }
 0x8a9   : > { %v1524_v42 = vmul.f32 %v2334_v40, %v1516_v30  ;;  %v1858_v40 = vshrl.u32 (!%p2104_p8), %v1857_v39, 7 }
 0x8ab   : > { %v1531_v35 = vmul.f32 %v2090_v41, %v1524_v42  ;;  %v1801_v41 = vld [vmem:[%s2883_s30] sm:$0x1] (!%p2104_p8)  ;;  %v1859_v42 = vsub.s32 (!%p2104_p8), 0, %v1858_v40 }
 0x8ad   : > { %v1538_v44 = vadd.f32 %v2091_v43, %v1531_v35 }
 0x8af   : > { %v1539_v31 = vpack.c.bf16 %v1538_v44, %v1538_v44 }
 0x8b1   : > { %2222 = vmatmul.mubr.msk.bf16.vlgmr.msra.gmra.mrb[20].mxu0 %vm906_vm2, %v1539_v31 }
 0x8b2   : > { %2238 = vmatpush3.bf16.msra.mxu0 (!%p2104_p8), %v2339_v23  ;;  %2241 = vmatprep.mubr.msk.bf16.mxu0 (!%p2104_p8), %vm2396_vm8, %v2395_v24 }
 0x8b3   : > { %2239 = vmatprep.subr.bf16.mxu0 (!%p2104_p8), %v2395_v24 }
 0x8b6   : > { %2240 = vmatpush3.bf16.msra.mxu0 (!%p2104_p8), %v2340_v25 }
 0x984   : > { %v1600_v49 = vpop.f32.mrb[20].mxu0 }
 0x985   : > { %v1601_v50 = vadd.f32 %v2092_v48, %v1600_v49  ;;  %v2223_v51 = vpop.f32.mrb[21].mxu0 }
 0x986   : > { %v1603_v52 = vpop.f32.mrb[22].mxu0 }
 0x987   : > { %v1607_v53 = vmul.f32 0.044715, %v1601_v50  ;;  %v2224_v54 = vpop.f32.mrb[23].mxu0  ;;  %v1606_v17 = vmul.f32 0.5, %v1601_v50 }
 0x989   : > { %v1608_v55 = vmul.f32 %v1607_v53, %v1601_v50 }
 0x98b   : > { %v1609_v56 = vmul.f32 %v1608_v55, %v1601_v50 }
 0x98d   : > { %v1610_v57 = vadd.f32 %v1609_v56, %v1601_v50 }
 0x98f   : > { %v1611_v58 = vmul.f32 0.7978846, %v1610_v57 }
 0x991   : > { %2335 = vtanh.f32 %v1611_v58 }
 0x99b   : > { %v2336_v59 = vpop.eup %2335 }
 0x99c   : > { %v1613_v60 = vadd.f32 1.0, %v2336_v59 }
 0x99e   : > { %v1614_v61 = vmul.f32 %v1613_v60, %v1606_v17 }
 0x9a0   : > { %v1615_v62 = vpack.c.bf16 %v1614_v61, %v1614_v61 }
 0x9a2   : > { %2234 = vmatmul.mubr.msk.bf16.vlgmr.msra.gmra.mrb[20].mxu1 %vm1655_vm7, %v1615_v62 }
 0x9a3   : > { %2249 = vmatprep.mubr.msk.bf16.mxu1 (!%p2104_p8), %vm2396_vm8, %v2395_v24  ;;  %2246 = vmatpush3.bf16.msra.mxu1 (!%p2104_p8), %v2341_v27 }
 0x9a4   : > { %2247 = vmatprep.subr.bf16.mxu1 (!%p2104_p8), %v2395_v24 }
 0x9a7   : > { %2248 = vmatpush3.bf16.msra.mxu1 (!%p2104_p8), %v2342_v28 }
 0xa75   : > { %v1693_v0 = vpop.f32.mrb[20].mxu1 }
 0xa76   : > { %v1694_v1 = vadd.f32 %v2096_v63, %v1693_v0  ;;  %v2235_v2 = vpop.f32.mrb[21].mxu1 }
 0xa77   : > { %v1696_v3 = vpop.f32.mrb[22].mxu1 }
 0xa78   : > { %v2236_v4 = vpop.f32.mrb[23].mxu1  ;;  %v1699_v5 = vadd.f32 %v1694_v1, %v1538_v44 }
 0xa7a   : > { %v1702_v6 = vsel %vm906_vm2, %v1699_v5, 0.0 }
 0xa7b   : > { %1703 = vadd.xlane.f32.xlu0 %v1702_v6 }
 0xb08   : > { %v1704_v7 = vpop.xlane.xlu0 %1703 }
 0xb09   : > { %v1705_v8 = vmul.f32 0.03125, %v1704_v7 }
 0xb0b   : > { %v1706_v9 = vsub.f32 %v1699_v5, %v1705_v8 }
 0xb0d   : > { %v1707_v10 = vmul.f32 %v1706_v9, %v1706_v9 }
 0xb0f   : > { %v1708_v11 = vsel %vm906_vm2, %v1707_v10, 0.0 }
 0xb10   : > { %1709 = vadd.xlane.f32.xlu1 %v1708_v11 }
 0xb9d   : > { %v1710_v12 = vpop.xlane.xlu1 %1709 }
 0xb9e   : > { %v1711_v13 = vmul.f32 0.03125, %v1710_v12 }
 0xba0   : > { %v1712_v14 = vadd.f32 1e-12, %v1711_v13 }
 0xba2   : > { %2337 = vrsqrt.f32 %v1712_v14 }
 0xbac   : > { %v2338_v15 = vpop.eup %2337 }
 0xbad   : > { %v1714_v18 = vmul.f32 %v2338_v15, %v1706_v9  ;;  %1733 = sbr.rel (%p2104_p8) target bundleno = 3441 (0xd71), region = 108 }
 0xbaf   : > { %v1721_v21 = vmul.f32 %v2102_v16, %v1714_v18 }
 0xbb1   : > { %v1728_v22 = vadd.f32 %v2103_v20, %v1721_v21 }
 0xbb3   : > { %1729 = vst.msk [vmem:[#allocation2] sm:$0xff] %vm906_vm2, %v1728_v22  ;;  %v1734_v26 = vpack.c.bf16 (!%p2104_p8), %v1728_v22, %v1728_v22 }
 0xbb5   : > { %2242 = vmatmul.mubr.msk.bf16.vlgmr.msra.gmra.mrb[0].mxu0 %vm906_vm2, %v1734_v26 }
 0xc88   : > { %v1789_v30 = vpop.f32.mrb[0].mxu0 }
 0xc89   : > { %v1790_v33 = vadd.f32 %v1789_v30, %v1739_v29  ;;  %v2243_v34 = vpop.f32.mrb[1].mxu0 }
 0xc8a   : > { %v1792_v36 = vpop.f32.mrb[2].mxu0 }
 0xc8b   : > { %2343 = vtanh.f32 %v1790_v33  ;;  %v2244_v37 = vpop.f32.mrb[3].mxu0 }
 0xc95   : > { %v2344_v19 = vpop.eup %2343 }
 0xc96   : > { %v1796_v38 = vpack.c.bf16 %v2344_v19, %v2344_v19 }
 0xc98   : > { %2250 = vmatmul.mubr.msk.bf16.vlgmr.msra.gmra.mrb[0].mxu1 %vm906_vm2, %v1796_v38 }
 0xd6b   : > { %v1851_v43 = vpop.f32.mrb[0].mxu1 }
 0xd6c   : > { %v1852_v35 = vadd.f32 %v1851_v43, %v1801_v41  ;;  %v2251_v44 = vpop.f32.mrb[1].mxu1 }
 0xd6d   : > { %v1854_v31 = vpop.f32.mrb[2].mxu1 }
 0xd6e   : > { %v1860_v32 = vrot.slane %v1852_v35, %v1859_v42  ;;  %v2252_v45 = vpop.f32.mrb[3].mxu1 }
 0xd70   : > { %1861 = vst [vmem:[%s2605_s11] sm:$0xff] %v1860_v32 }
 0xd71 PF: > { %s2884_s1 = sld [smem:[#allocation6_spill]]  ;;  %s2886_s22 = sld [smem:[#allocation5_spill]] }
 0xd72   : > { %s2887_s23 = sld [smem:[#allocation7_spill]]  ;;  %s2888_s24 = sld [smem:[#allocation8_spill]] }
 0xd77   : > { %s30_s2 = sadd.s32 1, %s2884_s1   ;;  %s2885_s1 = sld [smem:[#allocation4_spill]] }
 0xd78   : > { %p27_p9 = scmp.ge.s32.totalorder %s30_s2, 6  }
 0xd7a   :  { %29 = sbr.rel (!%p27_p9) target bundleno = 15 (0xf), region = 177 }

</bundles_post_ra>
